<compile_context>
chip_gen: v7x
topology: tpu7x:2x2x1
jax: 0.10.0
libtpu: 0.0.40
codegen_flags: <defaults>
</compile_context>

<pallas_src>
import functools

import jax
import jax.numpy as jnp
from jax import lax
from jax.experimental import pallas as pl
from jax.experimental.pallas import tpu as pltpu

EPS = 1e-5  # nn.BatchNorm2d default eps


# ----------------------------------------------------------------------------
# Fused bottleneck kernel (one grid step = one image)
# ----------------------------------------------------------------------------
def _bottleneck_kernel(x_ref, w1_ref, b1_ref, w2_ref, b2_ref, w3_ref, b3_ref,
                       ws_ref, bs_ref, o_ref, o1p_scr, xst_scr,
                       *, H, W, Ho, Wo, stride, cmid):
    f32 = jnp.float32
    wdtype = w1_ref.dtype
    Wp = W + 2  # padded width (pad=1 for the 3x3 conv)

    # ---- conv1 (1x1, groups folded to block-diag) + bn1 + relu  -> f32 ----
    x2d = x_ref[0]                                            # (H*W, Cin)
    o1 = jnp.dot(x2d, w1_ref[...], preferred_element_type=f32)
    o1 = jnp.maximum(o1 + b1_ref[...], 0.0)                   # (H*W, Cmid) f32

    # ---- scatter o1 into the zero-padded spatial scratch (stays in VMEM) ----
    o1p_scr[...] = jnp.zeros_like(o1p_scr)
    for h in range(H):
        o1p_scr[pl.ds((h + 1) * Wp + 1, W), :] = o1[h * W:(h + 1) * W, :]

    def strided_rows(ref, start):
        # Wo rows starting at flat row `start`, spaced by `stride` (32-bit data).
        if stride == 1:
            return ref[pl.ds(start, Wo), :]
        return ref[pl.ds(start, Wo, stride), :]

    # ---- conv2 (3x3, stride, pad=1) + bn2 + relu: 9 accumulating taps ----
    acc2 = None
    for ky in range(3):
        for kx in range(3):
            rows = [strided_rows(o1p_scr, (oy * stride + ky) * Wp + kx)
                    for oy in range(Ho)]
            tap = jnp.concatenate(rows, axis=0).astype(wdtype)   # (Ho*Wo, Cmid)
            t = ky * 3 + kx
            wtap = w2_ref[t * cmid:(t + 1) * cmid, :]
            d = jnp.dot(tap, wtap, preferred_element_type=f32)
            acc2 = d if acc2 is None else acc2 + d
    o2 = jnp.maximum(acc2 + b2_ref[...], 0.0).astype(wdtype)     # (Ho*Wo, Cmid)
    # nn.Dropout2d is identity in eval mode.

    # ---- conv3 (1x1) + bn3 ----
    main = jnp.dot(o2, w3_ref[...], preferred_element_type=f32) + b3_ref[...]

    # ---- shortcut: in-kernel stride-s spatial subsample, 1x1 conv + bn ----
    if stride == 1:
        xs = x2d
    else:
        xst_scr[...] = x2d.astype(f32)                           # 32-bit staging
        rows = [strided_rows(xst_scr, oy * stride * W) for oy in range(Ho)]
        xs = jnp.concatenate(rows, axis=0).astype(wdtype)        # (Ho*Wo, Cin)
    sc = jnp.dot(xs, ws_ref[...], preferred_element_type=f32) + bs_ref[...]

    # ---- residual add + final relu; single lane-dense HBM write ----
    o_ref[0] = jnp.maximum(main + sc, 0.0).astype(o_ref.dtype)


# ----------------------------------------------------------------------------
# Wrapper: one pallas_call for the whole block, grid over the batch
# ----------------------------------------------------------------------------
def packed_bottleneck_forward(x_nchw, pp, *, stride, compute_dtype=jnp.bfloat16):
    n, cin, h, w = x_nchw.shape
    ho = (h + 2 - 3) // stride + 1
    wo = (w + 2 - 3) // stride + 1
    cmid = pp["w1"].shape[1]
    cout = pp["w3"].shape[1]

    # Single boundary relayout to channels-last; kept flat [H*W, C] for matmuls.
    x = jnp.transpose(x_nchw, (0, 2, 3, 1)).reshape(n, h * w, cin).astype(compute_dtype)

    kern = functools.partial(_bottleneck_kernel, H=h, W=w, Ho=ho, Wo=wo,
                             stride=stride, cmid=cmid)

    itemsize = jnp.dtype(compute_dtype).itemsize
    flops = 2 * n * (h * w * cin * cmid
                     + ho * wo * (9 * cmid * cmid + cmid * cout + cin * cout))
    bytes_accessed = (n * h * w * cin * itemsize
                      + sum(int(v.size) * v.dtype.itemsize for v in pp.values())
                      + n * ho * wo * cout * itemsize)

    out = pl.pallas_call(
        kern,
        out_shape=jax.ShapeDtypeStruct((n, ho * wo, cout), compute_dtype),
        grid=(n,),
        in_specs=[
            pl.BlockSpec((1, h * w, cin), lambda i: (i, 0, 0)),   # x (per image)
            pl.BlockSpec((cin, cmid), lambda i: (0, 0)),          # w1 (bn1 folded)
            pl.BlockSpec((1, cmid), lambda i: (0, 0)),            # b1
            pl.BlockSpec((9 * cmid, cmid), lambda i: (0, 0)),     # w2 (bn2 folded)
            pl.BlockSpec((1, cmid), lambda i: (0, 0)),            # b2
            pl.BlockSpec((cmid, cout), lambda i: (0, 0)),         # w3 (bn3 folded)
            pl.BlockSpec((1, cout), lambda i: (0, 0)),            # b3
            pl.BlockSpec((cin, cout), lambda i: (0, 0)),          # ws (bns folded)
            pl.BlockSpec((1, cout), lambda i: (0, 0)),            # bs
        ],
        out_specs=pl.BlockSpec((1, ho * wo, cout), lambda i: (i, 0, 0)),
        scratch_shapes=[
            pltpu.VMEM(((h + 2) * (w + 2), cmid), jnp.float32),   # padded o1
            pltpu.VMEM((h * w, cin), jnp.float32),                # x staging (shortcut)
        ],
        compiler_params=pltpu.CompilerParams(dimension_semantics=("parallel",)),
        cost_estimate=pl.CostEstimate(flops=flops, transcendentals=0,
                                      bytes_accessed=bytes_accessed),
    )(x, pp["w1"], pp["b1"], pp["w2"], pp["b2"], pp["w3"], pp["b3"],
      pp["ws"], pp["bs"])

    # Module boundary back to NCHW (a stacked-block pipeline would stay NHWC/bf16).
    y = out.reshape(n, ho, wo, cout)
    return jnp.transpose(y, (0, 3, 1, 2)).astype(jnp.float32)


# ----------------------------------------------------------------------------
# Parameter packing (hoisted out of the hot path) -- plain JAX, runs once
# ----------------------------------------------------------------------------
def pack_blockdiag_weight(w, groups):
    """torch conv weight [Cout, Cin/G, kh, kw] -> dense f32 [kh*kw*Cin, Cout].

    Off-(group)diagonal blocks are exactly zero, so one dense matmul reproduces
    the grouped conv with no cross-group leakage and a lane-dense Cout output.
    K ordering is (ky, kx, channel) to match the in-kernel tap loop.
    """
    cout, cin_g, kh, kw = w.shape
    cout_g = cout // groups
    cin = cin_g * groups
    wg = w.reshape(groups, cout_g, cin_g, kh, kw)
    wg = jnp.transpose(wg, (0, 3, 4, 2, 1))            # [G, kh, kw, cin_g, cout_g]
    full = jnp.zeros((kh, kw, groups, cin_g, groups, cout_g), jnp.float32)
    gidx = jnp.arange(groups)
    full = full.at[:, :, gidx, :, gidx, :].set(wg.astype(jnp.float32))
    return full.reshape(kh * kw * cin, cout)


def prepare_params(p, groups, dtype):
    """Pack block-diagonal weights and fold eval-BN scale into them (in f32)."""
    def fold(conv_key, bn):
        w = pack_blockdiag_weight(p[conv_key], groups)               # f32 [K, Co]
        scale = p[bn + "_w"] / jnp.sqrt(p[bn + "_v"] + EPS)
        shift = p[bn + "_b"] - p[bn + "_m"] * scale
        # Fold scale BEFORE casting to the compute dtype (keeps bf16 rounding sane).
        return ((w * scale[None, :]).astype(dtype),
                shift.reshape(1, -1).astype(jnp.float32))

    pp = {}
    pp["w1"], pp["b1"] = fold("conv1_w", "bn1")
    pp["w2"], pp["b2"] = fold("conv2_w", "bn2")
    pp["w3"], pp["b3"] = fold("conv3_w", "bn3")
    pp["ws"], pp["bs"] = fold("convs_w", "bns")
    return pp


# ----------------------------------------------------------------------------
# Pure-JAX reference (lax.conv, f32) for verification
# ----------------------------------------------------------------------------
def ref_forward(x, p, *, stride, groups):
    def conv(xx, w, s, pad):
        return lax.conv_general_dilated(
            xx, w, (s, s), [(pad, pad), (pad, pad)],
            dimension_numbers=("NCHW", "OIHW", "NCHW"),
            feature_group_count=groups)

    def bn(xx, wt, b, m, v):
        sc = (wt / jnp.sqrt(v + EPS))[None, :, None, None]
        return (xx - m[None, :, None, None]) * sc + b[None, :, None, None]

    out = jax.nn.relu(bn(conv(x, p["conv1_w"], 1, 0), p["bn1_w"], p["bn1_b"], p["bn1_m"], p["bn1_v"]))
    out = jax.nn.relu(bn(conv(out, p["conv2_w"], stride, 1), p["bn2_w"], p["bn2_b"], p["bn2_m"], p["bn2_v"]))
    out = bn(conv(out, p["conv3_w"], 1, 0), p["bn3_w"], p["bn3_b"], p["bn3_m"], p["bn3_v"])
    sc = bn(conv(x, p["convs_w"], stride, 0), p["bns_w"], p["bns_b"], p["bns_m"], p["bns_v"])
    return jax.nn.relu(out + sc)


if __name__ == "__main__":
    # _Bottleneck config:
    #   in_planes=16, planes=16, stride=2, alpha=2, num_estimators=2, gamma=1,
    #   conv_bias=False, dropout_rate=0.0, groups=1, normalization_layer=BatchNorm2d.
    # PackedConv2d => grouped Conv2d with channels scaled by alpha,
    #   actual conv groups = gamma * groups * num_estimators = 2.
    in_planes, planes, stride = 16, 16, 2
    alpha, num_estimators, gamma, groups_arg = 2, 2, 1, 1
    expansion = 4
    G = gamma * groups_arg * num_estimators          # 2

    cin = int(in_planes * alpha)                     # 32
    cmid = int(planes * alpha)                       # 32
    cout = int(expansion * planes * alpha)           # 128

    key = jax.random.PRNGKey(0)
    keys = jax.random.split(key, 24)

    def nrm(k, shape, s=0.1):
        return jax.random.normal(k, shape, jnp.float32) * s

    def bn_params(k0, k1, k2, k3, c):
        return (1.0 + nrm(k0, (c,)),                                   # gamma
                nrm(k1, (c,)),                                         # beta
                nrm(k2, (c,)),                                         # running_mean
                jax.random.uniform(k3, (c,), jnp.float32, 0.5, 1.5))   # running_var

    p = {}
    p["conv1_w"] = nrm(keys[0], (cmid, cin // G, 1, 1))
    p["conv2_w"] = nrm(keys[1], (cmid, cmid // G, 3, 3))
    p["conv3_w"] = nrm(keys[2], (cout, cmid // G, 1, 1))
    p["convs_w"] = nrm(keys[3], (cout, cin // G, 1, 1))
    p["bn1_w"], p["bn1_b"], p["bn1_m"], p["bn1_v"] = bn_params(keys[4], keys[5], keys[6], keys[7], cmid)
    p["bn2_w"], p["bn2_b"], p["bn2_m"], p["bn2_v"] = bn_params(keys[8], keys[9], keys[10], keys[11], cmid)
    p["bn3_w"], p["bn3_b"], p["bn3_m"], p["bn3_v"] = bn_params(keys[12], keys[13], keys[14], keys[15], cout)
    p["bns_w"], p["bns_b"], p["bns_m"], p["bns_v"] = bn_params(keys[16], keys[17], keys[18], keys[19], cout)

    # Input: NCHW, channels already extended by alpha (as inside the packed ResNet).
    x = jax.random.normal(keys[20], (2, cin, 16, 16), jnp.float32)

    # Weight packing / BN folding hoisted out of the hot path.
    pp_bf16 = prepare_params(p, G, jnp.bfloat16)
    pp_f32 = prepare_params(p, G, jnp.float32)

    fwd_bf16 = jax.jit(lambda xx, params: packed_bottleneck_forward(
        xx, params, stride=stride, compute_dtype=jnp.bfloat16))
    fwd_f32 = jax.jit(lambda xx, params: packed_bottleneck_forward(
        xx, params, stride=stride, compute_dtype=jnp.float32))

    out = jax.block_until_ready(fwd_bf16(x, pp_bf16))       # production bf16 path
    out_hp = jax.block_until_ready(fwd_f32(x, pp_f32))      # f32 structural check
    ref = jax.block_until_ready(ref_forward(x, p, stride=stride, groups=G))

    assert out.shape == out_hp.shape == ref.shape == (2, cout, 8, 8), (out.shape, ref.shape)
    # f32 Pallas path vs f32 reference: tight enough to catch packing/BN bugs.
    err_hp = float(jnp.max(jnp.abs(out_hp - ref)))
    assert jnp.allclose(out_hp, ref, rtol=5e-2, atol=5e-2), err_hp
    # bf16 activations/weights vs f32 reference -> loosened tolerance.
    err_bf = float(jnp.max(jnp.abs(out - ref)))
    assert jnp.allclose(out, ref, rtol=1e-1, atol=1e-1), err_bf

    print("KERNEL_OK")
</pallas_src>

<mosaic_0001>
module attributes {stable_mosaic.version = 11 : i64} {
  func.func @_bottleneck_kernel(%arg0: i32, %arg1: memref<1x256x32xbf16, #tpu.memory_space<vmem>>, %arg2: memref<32x32xbf16, #tpu.memory_space<vmem>>, %arg3: memref<1x32xf32, #tpu.memory_space<vmem>>, %arg4: memref<288x32xbf16, #tpu.memory_space<vmem>>, %arg5: memref<1x32xf32, #tpu.memory_space<vmem>>, %arg6: memref<32x128xbf16, #tpu.memory_space<vmem>>, %arg7: memref<1x128xf32, #tpu.memory_space<vmem>>, %arg8: memref<32x128xbf16, #tpu.memory_space<vmem>>, %arg9: memref<1x128xf32, #tpu.memory_space<vmem>>, %arg10: memref<1x64x128xbf16, #tpu.memory_space<vmem>>, %arg11: memref<324x32xf32, #tpu.memory_space<vmem>>, %arg12: memref<256x32xf32, #tpu.memory_space<vmem>>) attributes {dimension_semantics = [#tpu.dimension_semantics<parallel>], iteration_bounds = array<i64: 2>, scalar_prefetch = 0 : i64, scratch_operands = 2 : i64, tpu.core_type = #tpu.core_type<tc>, window_params = [{transform_indices = @transform_0, window_bounds = array<i64: 1, 256, 32>}, {pipeline_mode = #tpu.pipeline_mode<synchronous>, transform_indices = @transform_1, window_bounds = array<i64: 32, 32>}, {pipeline_mode = #tpu.pipeline_mode<synchronous>, transform_indices = @transform_2, window_bounds = array<i64: 1, 32>}, {pipeline_mode = #tpu.pipeline_mode<synchronous>, transform_indices = @transform_3, window_bounds = array<i64: 288, 32>}, {pipeline_mode = #tpu.pipeline_mode<synchronous>, transform_indices = @transform_4, window_bounds = array<i64: 1, 32>}, {pipeline_mode = #tpu.pipeline_mode<synchronous>, transform_indices = @transform_5, window_bounds = array<i64: 32, 128>}, {pipeline_mode = #tpu.pipeline_mode<synchronous>, transform_indices = @transform_6, window_bounds = array<i64: 1, 128>}, {pipeline_mode = #tpu.pipeline_mode<synchronous>, transform_indices = @transform_7, window_bounds = array<i64: 32, 128>}, {pipeline_mode = #tpu.pipeline_mode<synchronous>, transform_indices = @transform_8, window_bounds = array<i64: 1, 128>}, {transform_indices = @transform_9, window_bounds = array<i64: 1, 64, 128>}]} {
    %c0 = arith.constant 0 : index
    %c0_0 = arith.constant 0 : index
    %c0_1 = arith.constant 0 : index
    %0 = vector.load %arg1[%c0, %c0_0, %c0_1] : memref<1x256x32xbf16, #tpu.memory_space<vmem>>, vector<1x256x32xbf16>
    %1 = vector.shape_cast %0 : vector<1x256x32xbf16> to vector<256x32xbf16>
    %c0_2 = arith.constant 0 : index
    %c0_3 = arith.constant 0 : index
    %2 = vector.load %arg2[%c0_2, %c0_3] : memref<32x32xbf16, #tpu.memory_space<vmem>>, vector<32x32xbf16>
    %cst = arith.constant dense<0.000000e+00> : vector<256x32xf32>
    %3 = tpu.matmul %1, %2, %cst {dimension_numbers = #tpu.dot_dimension_numbers<[1], [0], [0], [1], [0, 0, 1, 1], [], []>} : vector<256x32xbf16>, vector<32x32xbf16>, vector<256x32xf32> -> vector<256x32xf32>
    %c0_4 = arith.constant 0 : index
    %c0_5 = arith.constant 0 : index
    %4 = vector.load %arg3[%c0_4, %c0_5] : memref<1x32xf32, #tpu.memory_space<vmem>>, vector<1x32xf32>
    %5 = vector.broadcast %4 : vector<1x32xf32> to vector<256x32xf32>
    %6 = arith.addf %3, %5 : vector<256x32xf32>
    %cst_6 = arith.constant 0.000000e+00 : f32
    %7 = vector.broadcast %cst_6 : f32 to vector<256x32xf32>
    %8 = arith.maximumf %6, %7 : vector<256x32xf32>
    %cst_7 = arith.constant 0.000000e+00 : f32
    %9 = vector.broadcast %cst_7 : f32 to vector<324x32xf32>
    %c0_8 = arith.constant 0 : index
    %c0_9 = arith.constant 0 : index
    %10 = vector.load %arg11[%c0_8, %c0_9] : memref<324x32xf32, #tpu.memory_space<vmem>>, vector<324x32xf32>
    tpu.vector_store %arg11[%c0_8, %c0_9], %9 {strides = array<i32>} : memref<324x32xf32, #tpu.memory_space<vmem>>, vector<324x32xf32>,
    %11 = vector.extract_strided_slice %8 {offsets = [0, 0], sizes = [16, 32], strides = [1, 1]} : vector<256x32xf32> to vector<16x32xf32>
    %c19 = arith.constant 19 : index
    %c0_10 = arith.constant 0 : index
    %12 = vector.load %arg11[%c19, %c0_10] : memref<324x32xf32, #tpu.memory_space<vmem>>, vector<16x32xf32>
    tpu.vector_store %arg11[%c19, %c0_10], %11 {strides = array<i32>} : memref<324x32xf32, #tpu.memory_space<vmem>>, vector<16x32xf32>,
    %13 = vector.extract_strided_slice %8 {offsets = [16, 0], sizes = [16, 32], strides = [1, 1]} : vector<256x32xf32> to vector<16x32xf32>
    %c37 = arith.constant 37 : index
    %c0_11 = arith.constant 0 : index
    %14 = vector.load %arg11[%c37, %c0_11] : memref<324x32xf32, #tpu.memory_space<vmem>>, vector<16x32xf32>
    tpu.vector_store %arg11[%c37, %c0_11], %13 {strides = array<i32>} : memref<324x32xf32, #tpu.memory_space<vmem>>, vector<16x32xf32>,
    %15 = vector.extract_strided_slice %8 {offsets = [32, 0], sizes = [16, 32], strides = [1, 1]} : vector<256x32xf32> to vector<16x32xf32>
    %c55 = arith.constant 55 : index
    %c0_12 = arith.constant 0 : index
    %16 = vector.load %arg11[%c55, %c0_12] : memref<324x32xf32, #tpu.memory_space<vmem>>, vector<16x32xf32>
    tpu.vector_store %arg11[%c55, %c0_12], %15 {strides = array<i32>} : memref<324x32xf32, #tpu.memory_space<vmem>>, vector<16x32xf32>,
    %17 = vector.extract_strided_slice %8 {offsets = [48, 0], sizes = [16, 32], strides = [1, 1]} : vector<256x32xf32> to vector<16x32xf32>
    %c73 = arith.constant 73 : index
    %c0_13 = arith.constant 0 : index
    %18 = vector.load %arg11[%c73, %c0_13] : memref<324x32xf32, #tpu.memory_space<vmem>>, vector<16x32xf32>
    tpu.vector_store %arg11[%c73, %c0_13], %17 {strides = array<i32>} : memref<324x32xf32, #tpu.memory_space<vmem>>, vector<16x32xf32>,
    %19 = vector.extract_strided_slice %8 {offsets = [64, 0], sizes = [16, 32], strides = [1, 1]} : vector<256x32xf32> to vector<16x32xf32>
    %c91 = arith.constant 91 : index
    %c0_14 = arith.constant 0 : index
    %20 = vector.load %arg11[%c91, %c0_14] : memref<324x32xf32, #tpu.memory_space<vmem>>, vector<16x32xf32>
    tpu.vector_store %arg11[%c91, %c0_14], %19 {strides = array<i32>} : memref<324x32xf32, #tpu.memory_space<vmem>>, vector<16x32xf32>,
    %21 = vector.extract_strided_slice %8 {offsets = [80, 0], sizes = [16, 32], strides = [1, 1]} : vector<256x32xf32> to vector<16x32xf32>
    %c109 = arith.constant 109 : index
    %c0_15 = arith.constant 0 : index
    %22 = vector.load %arg11[%c109, %c0_15] : memref<324x32xf32, #tpu.memory_space<vmem>>, vector<16x32xf32>
    tpu.vector_store %arg11[%c109, %c0_15], %21 {strides = array<i32>} : memref<324x32xf32, #tpu.memory_space<vmem>>, vector<16x32xf32>,
    %23 = vector.extract_strided_slice %8 {offsets = [96, 0], sizes = [16, 32], strides = [1, 1]} : vector<256x32xf32> to vector<16x32xf32>
    %c127 = arith.constant 127 : index
    %c0_16 = arith.constant 0 : index
    %24 = vector.load %arg11[%c127, %c0_16] : memref<324x32xf32, #tpu.memory_space<vmem>>, vector<16x32xf32>
    tpu.vector_store %arg11[%c127, %c0_16], %23 {strides = array<i32>} : memref<324x32xf32, #tpu.memory_space<vmem>>, vector<16x32xf32>,
    %25 = vector.extract_strided_slice %8 {offsets = [112, 0], sizes = [16, 32], strides = [1, 1]} : vector<256x32xf32> to vector<16x32xf32>
    %c145 = arith.constant 145 : index
    %c0_17 = arith.constant 0 : index
    %26 = vector.load %arg11[%c145, %c0_17] : memref<324x32xf32, #tpu.memory_space<vmem>>, vector<16x32xf32>
    tpu.vector_store %arg11[%c145, %c0_17], %25 {strides = array<i32>} : memref<324x32xf32, #tpu.memory_space<vmem>>, vector<16x32xf32>,
    %27 = vector.extract_strided_slice %8 {offsets = [128, 0], sizes = [16, 32], strides = [1, 1]} : vector<256x32xf32> to vector<16x32xf32>
    %c163 = arith.constant 163 : index
    %c0_18 = arith.constant 0 : index
    %28 = vector.load %arg11[%c163, %c0_18] : memref<324x32xf32, #tpu.memory_space<vmem>>, vector<16x32xf32>
    tpu.vector_store %arg11[%c163, %c0_18], %27 {strides = array<i32>} : memref<324x32xf32, #tpu.memory_space<vmem>>, vector<16x32xf32>,
    %29 = vector.extract_strided_slice %8 {offsets = [144, 0], sizes = [16, 32], strides = [1, 1]} : vector<256x32xf32> to vector<16x32xf32>
    %c181 = arith.constant 181 : index
    %c0_19 = arith.constant 0 : index
    %30 = vector.load %arg11[%c181, %c0_19] : memref<324x32xf32, #tpu.memory_space<vmem>>, vector<16x32xf32>
    tpu.vector_store %arg11[%c181, %c0_19], %29 {strides = array<i32>} : memref<324x32xf32, #tpu.memory_space<vmem>>, vector<16x32xf32>,
    %31 = vector.extract_strided_slice %8 {offsets = [160, 0], sizes = [16, 32], strides = [1, 1]} : vector<256x32xf32> to vector<16x32xf32>
    %c199 = arith.constant 199 : index
    %c0_20 = arith.constant 0 : index
    %32 = vector.load %arg11[%c199, %c0_20] : memref<324x32xf32, #tpu.memory_space<vmem>>, vector<16x32xf32>
    tpu.vector_store %arg11[%c199, %c0_20], %31 {strides = array<i32>} : memref<324x32xf32, #tpu.memory_space<vmem>>, vector<16x32xf32>,
    %33 = vector.extract_strided_slice %8 {offsets = [176, 0], sizes = [16, 32], strides = [1, 1]} : vector<256x32xf32> to vector<16x32xf32>
    %c217 = arith.constant 217 : index
    %c0_21 = arith.constant 0 : index
    %34 = vector.load %arg11[%c217, %c0_21] : memref<324x32xf32, #tpu.memory_space<vmem>>, vector<16x32xf32>
    tpu.vector_store %arg11[%c217, %c0_21], %33 {strides = array<i32>} : memref<324x32xf32, #tpu.memory_space<vmem>>, vector<16x32xf32>,
    %35 = vector.extract_strided_slice %8 {offsets = [192, 0], sizes = [16, 32], strides = [1, 1]} : vector<256x32xf32> to vector<16x32xf32>
    %c235 = arith.constant 235 : index
    %c0_22 = arith.constant 0 : index
    %36 = vector.load %arg11[%c235, %c0_22] : memref<324x32xf32, #tpu.memory_space<vmem>>, vector<16x32xf32>
    tpu.vector_store %arg11[%c235, %c0_22], %35 {strides = array<i32>} : memref<324x32xf32, #tpu.memory_space<vmem>>, vector<16x32xf32>,
    %37 = vector.extract_strided_slice %8 {offsets = [208, 0], sizes = [16, 32], strides = [1, 1]} : vector<256x32xf32> to vector<16x32xf32>
    %c253 = arith.constant 253 : index
    %c0_23 = arith.constant 0 : index
    %38 = vector.load %arg11[%c253, %c0_23] : memref<324x32xf32, #tpu.memory_space<vmem>>, vector<16x32xf32>
    tpu.vector_store %arg11[%c253, %c0_23], %37 {strides = array<i32>} : memref<324x32xf32, #tpu.memory_space<vmem>>, vector<16x32xf32>,
    %39 = vector.extract_strided_slice %8 {offsets = [224, 0], sizes = [16, 32], strides = [1, 1]} : vector<256x32xf32> to vector<16x32xf32>
    %c271 = arith.constant 271 : index
    %c0_24 = arith.constant 0 : index
    %40 = vector.load %arg11[%c271, %c0_24] : memref<324x32xf32, #tpu.memory_space<vmem>>, vector<16x32xf32>
    tpu.vector_store %arg11[%c271, %c0_24], %39 {strides = array<i32>} : memref<324x32xf32, #tpu.memory_space<vmem>>, vector<16x32xf32>,
    %41 = vector.extract_strided_slice %8 {offsets = [240, 0], sizes = [16, 32], strides = [1, 1]} : vector<256x32xf32> to vector<16x32xf32>
    %c289 = arith.constant 289 : index
    %c0_25 = arith.constant 0 : index
    %42 = vector.load %arg11[%c289, %c0_25] : memref<324x32xf32, #tpu.memory_space<vmem>>, vector<16x32xf32>
    tpu.vector_store %arg11[%c289, %c0_25], %41 {strides = array<i32>} : memref<324x32xf32, #tpu.memory_space<vmem>>, vector<16x32xf32>,
    %c0_26 = arith.constant 0 : index
    %c0_27 = arith.constant 0 : index
    %43 = tpu.strided_load %arg11[%c0_26, %c0_27] {strides = array<i32: 2, 1>} : memref<324x32xf32, #tpu.memory_space<vmem>>, vector<8x32xf32>
    %c36 = arith.constant 36 : index
    %c0_28 = arith.constant 0 : index
    %44 = tpu.strided_load %arg11[%c36, %c0_28] {strides = array<i32: 2, 1>} : memref<324x32xf32, #tpu.memory_space<vmem>>, vector<8x32xf32>
    %c72 = arith.constant 72 : index
    %c0_29 = arith.constant 0 : index
    %45 = tpu.strided_load %arg11[%c72, %c0_29] {strides = array<i32: 2, 1>} : memref<324x32xf32, #tpu.memory_space<vmem>>, vector<8x32xf32>
    %c108 = arith.constant 108 : index
    %c0_30 = arith.constant 0 : index
    %46 = tpu.strided_load %arg11[%c108, %c0_30] {strides = array<i32: 2, 1>} : memref<324x32xf32, #tpu.memory_space<vmem>>, vector<8x32xf32>
    %c144 = arith.constant 144 : index
    %c0_31 = arith.constant 0 : index
    %47 = tpu.strided_load %arg11[%c144, %c0_31] {strides = array<i32: 2, 1>} : memref<324x32xf32, #tpu.memory_space<vmem>>, vector<8x32xf32>
    %c180 = arith.constant 180 : index
    %c0_32 = arith.constant 0 : index
    %48 = tpu.strided_load %arg11[%c180, %c0_32] {strides = array<i32: 2, 1>} : memref<324x32xf32, #tpu.memory_space<vmem>>, vector<8x32xf32>
    %c216 = arith.constant 216 : index
    %c0_33 = arith.constant 0 : index
    %49 = tpu.strided_load %arg11[%c216, %c0_33] {strides = array<i32: 2, 1>} : memref<324x32xf32, #tpu.memory_space<vmem>>, vector<8x32xf32>
    %c252 = arith.constant 252 : index
    %c0_34 = arith.constant 0 : index
    %50 = tpu.strided_load %arg11[%c252, %c0_34] {strides = array<i32: 2, 1>} : memref<324x32xf32, #tpu.memory_space<vmem>>, vector<8x32xf32>
    %51 = tpu.concatenate %43, %44, %45, %46, %47, %48, %49, %50 in 0 : vector<8x32xf32>, vector<8x32xf32>, vector<8x32xf32>, vector<8x32xf32>, vector<8x32xf32>, vector<8x32xf32>, vector<8x32xf32>, vector<8x32xf32> -> vector<64x32xf32>
    %52 = arith.truncf %51 : vector<64x32xf32> to vector<64x32xbf16>
    %c0_35 = arith.constant 0 : index
    %c0_36 = arith.constant 0 : index
    %53 = vector.load %arg4[%c0_35, %c0_36] : memref<288x32xbf16, #tpu.memory_space<vmem>>, vector<32x32xbf16>
    %cst_37 = arith.constant dense<0.000000e+00> : vector<64x32xf32>
    %54 = tpu.matmul %52, %53, %cst_37 {dimension_numbers = #tpu.dot_dimension_numbers<[1], [0], [0], [1], [0, 0, 1, 1], [], []>} : vector<64x32xbf16>, vector<32x32xbf16>, vector<64x32xf32> -> vector<64x32xf32>
    %c1 = arith.constant 1 : index
    %c0_38 = arith.constant 0 : index
    %55 = tpu.strided_load %arg11[%c1, %c0_38] {strides = array<i32: 2, 1>} : memref<324x32xf32, #tpu.memory_space<vmem>>, vector<8x32xf32>
    %c37_39 = arith.constant 37 : index
    %c0_40 = arith.constant 0 : index
    %56 = tpu.strided_load %arg11[%c37_39, %c0_40] {strides = array<i32: 2, 1>} : memref<324x32xf32, #tpu.memory_space<vmem>>, vector<8x32xf32>
    %c73_41 = arith.constant 73 : index
    %c0_42 = arith.constant 0 : index
    %57 = tpu.strided_load %arg11[%c73_41, %c0_42] {strides = array<i32: 2, 1>} : memref<324x32xf32, #tpu.memory_space<vmem>>, vector<8x32xf32>
    %c109_43 = arith.constant 109 : index
    %c0_44 = arith.constant 0 : index
    %58 = tpu.strided_load %arg11[%c109_43, %c0_44] {strides = array<i32: 2, 1>} : memref<324x32xf32, #tpu.memory_space<vmem>>, vector<8x32xf32>
    %c145_45 = arith.constant 145 : index
    %c0_46 = arith.constant 0 : index
    %59 = tpu.strided_load %arg11[%c145_45, %c0_46] {strides = array<i32: 2, 1>} : memref<324x32xf32, #tpu.memory_space<vmem>>, vector<8x32xf32>
    %c181_47 = arith.constant 181 : index
    %c0_48 = arith.constant 0 : index
    %60 = tpu.strided_load %arg11[%c181_47, %c0_48] {strides = array<i32: 2, 1>} : memref<324x32xf32, #tpu.memory_space<vmem>>, vector<8x32xf32>
    %c217_49 = arith.constant 217 : index
    %c0_50 = arith.constant 0 : index
    %61 = tpu.strided_load %arg11[%c217_49, %c0_50] {strides = array<i32: 2, 1>} : memref<324x32xf32, #tpu.memory_space<vmem>>, vector<8x32xf32>
    %c253_51 = arith.constant 253 : index
    %c0_52 = arith.constant 0 : index
    %62 = tpu.strided_load %arg11[%c253_51, %c0_52] {strides = array<i32: 2, 1>} : memref<324x32xf32, #tpu.memory_space<vmem>>, vector<8x32xf32>
    %63 = tpu.concatenate %55, %56, %57, %58, %59, %60, %61, %62 in 0 : vector<8x32xf32>, vector<8x32xf32>, vector<8x32xf32>, vector<8x32xf32>, vector<8x32xf32>, vector<8x32xf32>, vector<8x32xf32>, vector<8x32xf32> -> vector<64x32xf32>
    %64 = arith.truncf %63 : vector<64x32xf32> to vector<64x32xbf16>
    %c32 = arith.constant 32 : index
    %c0_53 = arith.constant 0 : index
    %65 = vector.load %arg4[%c32, %c0_53] : memref<288x32xbf16, #tpu.memory_space<vmem>>, vector<32x32xbf16>
    %cst_54 = arith.constant dense<0.000000e+00> : vector<64x32xf32>
    %66 = tpu.matmul %64, %65, %cst_54 {dimension_numbers = #tpu.dot_dimension_numbers<[1], [0], [0], [1], [0, 0, 1, 1], [], []>} : vector<64x32xbf16>, vector<32x32xbf16>, vector<64x32xf32> -> vector<64x32xf32>
    %67 = arith.addf %54, %66 : vector<64x32xf32>
    %c2 = arith.constant 2 : index
    %c0_55 = arith.constant 0 : index
    %68 = tpu.strided_load %arg11[%c2, %c0_55] {strides = array<i32: 2, 1>} : memref<324x32xf32, #tpu.memory_space<vmem>>, vector<8x32xf32>
    %c38 = arith.constant 38 : index
    %c0_56 = arith.constant 0 : index
    %69 = tpu.strided_load %arg11[%c38, %c0_56] {strides = array<i32: 2, 1>} : memref<324x32xf32, #tpu.memory_space<vmem>>, vector<8x32xf32>
    %c74 = arith.constant 74 : index
    %c0_57 = arith.constant 0 : index
    %70 = tpu.strided_load %arg11[%c74, %c0_57] {strides = array<i32: 2, 1>} : memref<324x32xf32, #tpu.memory_space<vmem>>, vector<8x32xf32>
    %c110 = arith.constant 110 : index
    %c0_58 = arith.constant 0 : index
    %71 = tpu.strided_load %arg11[%c110, %c0_58] {strides = array<i32: 2, 1>} : memref<324x32xf32, #tpu.memory_space<vmem>>, vector<8x32xf32>
    %c146 = arith.constant 146 : index
    %c0_59 = arith.constant 0 : index
    %72 = tpu.strided_load %arg11[%c146, %c0_59] {strides = array<i32: 2, 1>} : memref<324x32xf32, #tpu.memory_space<vmem>>, vector<8x32xf32>
    %c182 = arith.constant 182 : index
    %c0_60 = arith.constant 0 : index
    %73 = tpu.strided_load %arg11[%c182, %c0_60] {strides = array<i32: 2, 1>} : memref<324x32xf32, #tpu.memory_space<vmem>>, vector<8x32xf32>
    %c218 = arith.constant 218 : index
    %c0_61 = arith.constant 0 : index
    %74 = tpu.strided_load %arg11[%c218, %c0_61] {strides = array<i32: 2, 1>} : memref<324x32xf32, #tpu.memory_space<vmem>>, vector<8x32xf32>
    %c254 = arith.constant 254 : index
    %c0_62 = arith.constant 0 : index
    %75 = tpu.strided_load %arg11[%c254, %c0_62] {strides = array<i32: 2, 1>} : memref<324x32xf32, #tpu.memory_space<vmem>>, vector<8x32xf32>
    %76 = tpu.concatenate %68, %69, %70, %71, %72, %73, %74, %75 in 0 : vector<8x32xf32>, vector<8x32xf32>, vector<8x32xf32>, vector<8x32xf32>, vector<8x32xf32>, vector<8x32xf32>, vector<8x32xf32>, vector<8x32xf32> -> vector<64x32xf32>
    %77 = arith.truncf %76 : vector<64x32xf32> to vector<64x32xbf16>
    %c64 = arith.constant 64 : index
    %c0_63 = arith.constant 0 : index
    %78 = vector.load %arg4[%c64, %c0_63] : memref<288x32xbf16, #tpu.memory_space<vmem>>, vector<32x32xbf16>
    %cst_64 = arith.constant dense<0.000000e+00> : vector<64x32xf32>
    %79 = tpu.matmul %77, %78, %cst_64 {dimension_numbers = #tpu.dot_dimension_numbers<[1], [0], [0], [1], [0, 0, 1, 1], [], []>} : vector<64x32xbf16>, vector<32x32xbf16>, vector<64x32xf32> -> vector<64x32xf32>
    %80 = arith.addf %67, %79 : vector<64x32xf32>
    %c18 = arith.constant 18 : index
    %c0_65 = arith.constant 0 : index
    %81 = tpu.strided_load %arg11[%c18, %c0_65] {strides = array<i32: 2, 1>} : memref<324x32xf32, #tpu.memory_space<vmem>>, vector<8x32xf32>
    %c54 = arith.constant 54 : index
    %c0_66 = arith.constant 0 : index
    %82 = tpu.strided_load %arg11[%c54, %c0_66] {strides = array<i32: 2, 1>} : memref<324x32xf32, #tpu.memory_space<vmem>>, vector<8x32xf32>
    %c90 = arith.constant 90 : index
    %c0_67 = arith.constant 0 : index
    %83 = tpu.strided_load %arg11[%c90, %c0_67] {strides = array<i32: 2, 1>} : memref<324x32xf32, #tpu.memory_space<vmem>>, vector<8x32xf32>
    %c126 = arith.constant 126 : index
    %c0_68 = arith.constant 0 : index
    %84 = tpu.strided_load %arg11[%c126, %c0_68] {strides = array<i32: 2, 1>} : memref<324x32xf32, #tpu.memory_space<vmem>>, vector<8x32xf32>
    %c162 = arith.constant 162 : index
    %c0_69 = arith.constant 0 : index
    %85 = tpu.strided_load %arg11[%c162, %c0_69] {strides = array<i32: 2, 1>} : memref<324x32xf32, #tpu.memory_space<vmem>>, vector<8x32xf32>
    %c198 = arith.constant 198 : index
    %c0_70 = arith.constant 0 : index
    %86 = tpu.strided_load %arg11[%c198, %c0_70] {strides = array<i32: 2, 1>} : memref<324x32xf32, #tpu.memory_space<vmem>>, vector<8x32xf32>
    %c234 = arith.constant 234 : index
    %c0_71 = arith.constant 0 : index
    %87 = tpu.strided_load %arg11[%c234, %c0_71] {strides = array<i32: 2, 1>} : memref<324x32xf32, #tpu.memory_space<vmem>>, vector<8x32xf32>
    %c270 = arith.constant 270 : index
    %c0_72 = arith.constant 0 : index
    %88 = tpu.strided_load %arg11[%c270, %c0_72] {strides = array<i32: 2, 1>} : memref<324x32xf32, #tpu.memory_space<vmem>>, vector<8x32xf32>
    %89 = tpu.concatenate %81, %82, %83, %84, %85, %86, %87, %88 in 0 : vector<8x32xf32>, vector<8x32xf32>, vector<8x32xf32>, vector<8x32xf32>, vector<8x32xf32>, vector<8x32xf32>, vector<8x32xf32>, vector<8x32xf32> -> vector<64x32xf32>
    %90 = arith.truncf %89 : vector<64x32xf32> to vector<64x32xbf16>
    %c96 = arith.constant 96 : index
    %c0_73 = arith.constant 0 : index
    %91 = vector.load %arg4[%c96, %c0_73] : memref<288x32xbf16, #tpu.memory_space<vmem>>, vector<32x32xbf16>
    %cst_74 = arith.constant dense<0.000000e+00> : vector<64x32xf32>
    %92 = tpu.matmul %90, %91, %cst_74 {dimension_numbers = #tpu.dot_dimension_numbers<[1], [0], [0], [1], [0, 0, 1, 1], [], []>} : vector<64x32xbf16>, vector<32x32xbf16>, vector<64x32xf32> -> vector<64x32xf32>
    %93 = arith.addf %80, %92 : vector<64x32xf32>
    %c19_75 = arith.constant 19 : index
    %c0_76 = arith.constant 0 : index
    %94 = tpu.strided_load %arg11[%c19_75, %c0_76] {strides = array<i32: 2, 1>} : memref<324x32xf32, #tpu.memory_space<vmem>>, vector<8x32xf32>
    %c55_77 = arith.constant 55 : index
    %c0_78 = arith.constant 0 : index
    %95 = tpu.strided_load %arg11[%c55_77, %c0_78] {strides = array<i32: 2, 1>} : memref<324x32xf32, #tpu.memory_space<vmem>>, vector<8x32xf32>
    %c91_79 = arith.constant 91 : index
    %c0_80 = arith.constant 0 : index
    %96 = tpu.strided_load %arg11[%c91_79, %c0_80] {strides = array<i32: 2, 1>} : memref<324x32xf32, #tpu.memory_space<vmem>>, vector<8x32xf32>
    %c127_81 = arith.constant 127 : index
    %c0_82 = arith.constant 0 : index
    %97 = tpu.strided_load %arg11[%c127_81, %c0_82] {strides = array<i32: 2, 1>} : memref<324x32xf32, #tpu.memory_space<vmem>>, vector<8x32xf32>
    %c163_83 = arith.constant 163 : index
    %c0_84 = arith.constant 0 : index
    %98 = tpu.strided_load %arg11[%c163_83, %c0_84] {strides = array<i32: 2, 1>} : memref<324x32xf32, #tpu.memory_space<vmem>>, vector<8x32xf32>
    %c199_85 = arith.constant 199 : index
    %c0_86 = arith.constant 0 : index
    %99 = tpu.strided_load %arg11[%c199_85, %c0_86] {strides = array<i32: 2, 1>} : memref<324x32xf32, #tpu.memory_space<vmem>>, vector<8x32xf32>
    %c235_87 = arith.constant 235 : index
    %c0_88 = arith.constant 0 : index
    %100 = tpu.strided_load %arg11[%c235_87, %c0_88] {strides = array<i32: 2, 1>} : memref<324x32xf32, #tpu.memory_space<vmem>>, vector<8x32xf32>
    %c271_89 = arith.constant 271 : index
    %c0_90 = arith.constant 0 : index
    %101 = tpu.strided_load %arg11[%c271_89, %c0_90] {strides = array<i32: 2, 1>} : memref<324x32xf32, #tpu.memory_space<vmem>>, vector<8x32xf32>
    %102 = tpu.concatenate %94, %95, %96, %97, %98, %99, %100, %101 in 0 : vector<8x32xf32>, vector<8x32xf32>, vector<8x32xf32>, vector<8x32xf32>, vector<8x32xf32>, vector<8x32xf32>, vector<8x32xf32>, vector<8x32xf32> -> vector<64x32xf32>
    %103 = arith.truncf %102 : vector<64x32xf32> to vector<64x32xbf16>
    %c128 = arith.constant 128 : index
    %c0_91 = arith.constant 0 : index
    %104 = vector.load %arg4[%c128, %c0_91] : memref<288x32xbf16, #tpu.memory_space<vmem>>, vector<32x32xbf16>
    %cst_92 = arith.constant dense<0.000000e+00> : vector<64x32xf32>
    %105 = tpu.matmul %103, %104, %cst_92 {dimension_numbers = #tpu.dot_dimension_numbers<[1], [0], [0], [1], [0, 0, 1, 1], [], []>} : vector<64x32xbf16>, vector<32x32xbf16>, vector<64x32xf32> -> vector<64x32xf32>
    %106 = arith.addf %93, %105 : vector<64x32xf32>
    %c20 = arith.constant 20 : index
    %c0_93 = arith.constant 0 : index
    %107 = tpu.strided_load %arg11[%c20, %c0_93] {strides = array<i32: 2, 1>} : memref<324x32xf32, #tpu.memory_space<vmem>>, vector<8x32xf32>
    %c56 = arith.constant 56 : index
    %c0_94 = arith.constant 0 : index
    %108 = tpu.strided_load %arg11[%c56, %c0_94] {strides = array<i32: 2, 1>} : memref<324x32xf32, #tpu.memory_space<vmem>>, vector<8x32xf32>
    %c92 = arith.constant 92 : index
    %c0_95 = arith.constant 0 : index
    %109 = tpu.strided_load %arg11[%c92, %c0_95] {strides = array<i32: 2, 1>} : memref<324x32xf32, #tpu.memory_space<vmem>>, vector<8x32xf32>
    %c128_96 = arith.constant 128 : index
    %c0_97 = arith.constant 0 : index
    %110 = tpu.strided_load %arg11[%c128_96, %c0_97] {strides = array<i32: 2, 1>} : memref<324x32xf32, #tpu.memory_space<vmem>>, vector<8x32xf32>
    %c164 = arith.constant 164 : index
    %c0_98 = arith.constant 0 : index
    %111 = tpu.strided_load %arg11[%c164, %c0_98] {strides = array<i32: 2, 1>} : memref<324x32xf32, #tpu.memory_space<vmem>>, vector<8x32xf32>
    %c200 = arith.constant 200 : index
    %c0_99 = arith.constant 0 : index
    %112 = tpu.strided_load %arg11[%c200, %c0_99] {strides = array<i32: 2, 1>} : memref<324x32xf32, #tpu.memory_space<vmem>>, vector<8x32xf32>
    %c236 = arith.constant 236 : index
    %c0_100 = arith.constant 0 : index
    %113 = tpu.strided_load %arg11[%c236, %c0_100] {strides = array<i32: 2, 1>} : memref<324x32xf32, #tpu.memory_space<vmem>>, vector<8x32xf32>
    %c272 = arith.constant 272 : index
    %c0_101 = arith.constant 0 : index
    %114 = tpu.strided_load %arg11[%c272, %c0_101] {strides = array<i32: 2, 1>} : memref<324x32xf32, #tpu.memory_space<vmem>>, vector<8x32xf32>
    %115 = tpu.concatenate %107, %108, %109, %110, %111, %112, %113, %114 in 0 : vector<8x32xf32>, vector<8x32xf32>, vector<8x32xf32>, vector<8x32xf32>, vector<8x32xf32>, vector<8x32xf32>, vector<8x32xf32>, vector<8x32xf32> -> vector<64x32xf32>
    %116 = arith.truncf %115 : vector<64x32xf32> to vector<64x32xbf16>
    %c160 = arith.constant 160 : index
    %c0_102 = arith.constant 0 : index
    %117 = vector.load %arg4[%c160, %c0_102] : memref<288x32xbf16, #tpu.memory_space<vmem>>, vector<32x32xbf16>
    %cst_103 = arith.constant dense<0.000000e+00> : vector<64x32xf32>
    %118 = tpu.matmul %116, %117, %cst_103 {dimension_numbers = #tpu.dot_dimension_numbers<[1], [0], [0], [1], [0, 0, 1, 1], [], []>} : vector<64x32xbf16>, vector<32x32xbf16>, vector<64x32xf32> -> vector<64x32xf32>
    %119 = arith.addf %106, %118 : vector<64x32xf32>
    %c36_104 = arith.constant 36 : index
    %c0_105 = arith.constant 0 : index
    %120 = tpu.strided_load %arg11[%c36_104, %c0_105] {strides = array<i32: 2, 1>} : memref<324x32xf32, #tpu.memory_space<vmem>>, vector<8x32xf32>
    %c72_106 = arith.constant 72 : index
    %c0_107 = arith.constant 0 : index
    %121 = tpu.strided_load %arg11[%c72_106, %c0_107] {strides = array<i32: 2, 1>} : memref<324x32xf32, #tpu.memory_space<vmem>>, vector<8x32xf32>
    %c108_108 = arith.constant 108 : index
    %c0_109 = arith.constant 0 : index
    %122 = tpu.strided_load %arg11[%c108_108, %c0_109] {strides = array<i32: 2, 1>} : memref<324x32xf32, #tpu.memory_space<vmem>>, vector<8x32xf32>
    %c144_110 = arith.constant 144 : index
    %c0_111 = arith.constant 0 : index
    %123 = tpu.strided_load %arg11[%c144_110, %c0_111] {strides = array<i32: 2, 1>} : memref<324x32xf32, #tpu.memory_space<vmem>>, vector<8x32xf32>
    %c180_112 = arith.constant 180 : index
    %c0_113 = arith.constant 0 : index
    %124 = tpu.strided_load %arg11[%c180_112, %c0_113] {strides = array<i32: 2, 1>} : memref<324x32xf32, #tpu.memory_space<vmem>>, vector<8x32xf32>
    %c216_114 = arith.constant 216 : index
    %c0_115 = arith.constant 0 : index
    %125 = tpu.strided_load %arg11[%c216_114, %c0_115] {strides = array<i32: 2, 1>} : memref<324x32xf32, #tpu.memory_space<vmem>>, vector<8x32xf32>
    %c252_116 = arith.constant 252 : index
    %c0_117 = arith.constant 0 : index
    %126 = tpu.strided_load %arg11[%c252_116, %c0_117] {strides = array<i32: 2, 1>} : memref<324x32xf32, #tpu.memory_space<vmem>>, vector<8x32xf32>
    %c288 = arith.constant 288 : index
    %c0_118 = arith.constant 0 : index
    %127 = tpu.strided_load %arg11[%c288, %c0_118] {strides = array<i32: 2, 1>} : memref<324x32xf32, #tpu.memory_space<vmem>>, vector<8x32xf32>
    %128 = tpu.concatenate %120, %121, %122, %123, %124, %125, %126, %127 in 0 : vector<8x32xf32>, vector<8x32xf32>, vector<8x32xf32>, vector<8x32xf32>, vector<8x32xf32>, vector<8x32xf32>, vector<8x32xf32>, vector<8x32xf32> -> vector<64x32xf32>
    %129 = arith.truncf %128 : vector<64x32xf32> to vector<64x32xbf16>
    %c192 = arith.constant 192 : index
    %c0_119 = arith.constant 0 : index
    %130 = vector.load %arg4[%c192, %c0_119] : memref<288x32xbf16, #tpu.memory_space<vmem>>, vector<32x32xbf16>
    %cst_120 = arith.constant dense<0.000000e+00> : vector<64x32xf32>
    %131 = tpu.matmul %129, %130, %cst_120 {dimension_numbers = #tpu.dot_dimension_numbers<[1], [0], [0], [1], [0, 0, 1, 1], [], []>} : vector<64x32xbf16>, vector<32x32xbf16>, vector<64x32xf32> -> vector<64x32xf32>
    %132 = arith.addf %119, %131 : vector<64x32xf32>
    %c37_121 = arith.constant 37 : index
    %c0_122 = arith.constant 0 : index
    %133 = tpu.strided_load %arg11[%c37_121, %c0_122] {strides = array<i32: 2, 1>} : memref<324x32xf32, #tpu.memory_space<vmem>>, vector<8x32xf32>
    %c73_123 = arith.constant 73 : index
    %c0_124 = arith.constant 0 : index
    %134 = tpu.strided_load %arg11[%c73_123, %c0_124] {strides = array<i32: 2, 1>} : memref<324x32xf32, #tpu.memory_space<vmem>>, vector<8x32xf32>
    %c109_125 = arith.constant 109 : index
    %c0_126 = arith.constant 0 : index
    %135 = tpu.strided_load %arg11[%c109_125, %c0_126] {strides = array<i32: 2, 1>} : memref<324x32xf32, #tpu.memory_space<vmem>>, vector<8x32xf32>
    %c145_127 = arith.constant 145 : index
    %c0_128 = arith.constant 0 : index
    %136 = tpu.strided_load %arg11[%c145_127, %c0_128] {strides = array<i32: 2, 1>} : memref<324x32xf32, #tpu.memory_space<vmem>>, vector<8x32xf32>
    %c181_129 = arith.constant 181 : index
    %c0_130 = arith.constant 0 : index
    %137 = tpu.strided_load %arg11[%c181_129, %c0_130] {strides = array<i32: 2, 1>} : memref<324x32xf32, #tpu.memory_space<vmem>>, vector<8x32xf32>
    %c217_131 = arith.constant 217 : index
    %c0_132 = arith.constant 0 : index
    %138 = tpu.strided_load %arg11[%c217_131, %c0_132] {strides = array<i32: 2, 1>} : memref<324x32xf32, #tpu.memory_space<vmem>>, vector<8x32xf32>
    %c253_133 = arith.constant 253 : index
    %c0_134 = arith.constant 0 : index
    %139 = tpu.strided_load %arg11[%c253_133, %c0_134] {strides = array<i32: 2, 1>} : memref<324x32xf32, #tpu.memory_space<vmem>>, vector<8x32xf32>
    %c289_135 = arith.constant 289 : index
    %c0_136 = arith.constant 0 : index
    %140 = tpu.strided_load %arg11[%c289_135, %c0_136] {strides = array<i32: 2, 1>} : memref<324x32xf32, #tpu.memory_space<vmem>>, vector<8x32xf32>
    %141 = tpu.concatenate %133, %134, %135, %136, %137, %138, %139, %140 in 0 : vector<8x32xf32>, vector<8x32xf32>, vector<8x32xf32>, vector<8x32xf32>, vector<8x32xf32>, vector<8x32xf32>, vector<8x32xf32>, vector<8x32xf32> -> vector<64x32xf32>
    %142 = arith.truncf %141 : vector<64x32xf32> to vector<64x32xbf16>
    %c224 = arith.constant 224 : index
    %c0_137 = arith.constant 0 : index
    %143 = vector.load %arg4[%c224, %c0_137] : memref<288x32xbf16, #tpu.memory_space<vmem>>, vector<32x32xbf16>
    %cst_138 = arith.constant dense<0.000000e+00> : vector<64x32xf32>
    %144 = tpu.matmul %142, %143, %cst_138 {dimension_numbers = #tpu.dot_dimension_numbers<[1], [0], [0], [1], [0, 0, 1, 1], [], []>} : vector<64x32xbf16>, vector<32x32xbf16>, vector<64x32xf32> -> vector<64x32xf32>
    %145 = arith.addf %132, %144 : vector<64x32xf32>
    %c38_139 = arith.constant 38 : index
    %c0_140 = arith.constant 0 : index
    %146 = tpu.strided_load %arg11[%c38_139, %c0_140] {strides = array<i32: 2, 1>} : memref<324x32xf32, #tpu.memory_space<vmem>>, vector<8x32xf32>
    %c74_141 = arith.constant 74 : index
    %c0_142 = arith.constant 0 : index
    %147 = tpu.strided_load %arg11[%c74_141, %c0_142] {strides = array<i32: 2, 1>} : memref<324x32xf32, #tpu.memory_space<vmem>>, vector<8x32xf32>
    %c110_143 = arith.constant 110 : index
    %c0_144 = arith.constant 0 : index
    %148 = tpu.strided_load %arg11[%c110_143, %c0_144] {strides = array<i32: 2, 1>} : memref<324x32xf32, #tpu.memory_space<vmem>>, vector<8x32xf32>
    %c146_145 = arith.constant 146 : index
    %c0_146 = arith.constant 0 : index
    %149 = tpu.strided_load %arg11[%c146_145, %c0_146] {strides = array<i32: 2, 1>} : memref<324x32xf32, #tpu.memory_space<vmem>>, vector<8x32xf32>
    %c182_147 = arith.constant 182 : index
    %c0_148 = arith.constant 0 : index
    %150 = tpu.strided_load %arg11[%c182_147, %c0_148] {strides = array<i32: 2, 1>} : memref<324x32xf32, #tpu.memory_space<vmem>>, vector<8x32xf32>
    %c218_149 = arith.constant 218 : index
    %c0_150 = arith.constant 0 : index
    %151 = tpu.strided_load %arg11[%c218_149, %c0_150] {strides = array<i32: 2, 1>} : memref<324x32xf32, #tpu.memory_space<vmem>>, vector<8x32xf32>
    %c254_151 = arith.constant 254 : index
    %c0_152 = arith.constant 0 : index
    %152 = tpu.strided_load %arg11[%c254_151, %c0_152] {strides = array<i32: 2, 1>} : memref<324x32xf32, #tpu.memory_space<vmem>>, vector<8x32xf32>
    %c290 = arith.constant 290 : index
    %c0_153 = arith.constant 0 : index
    %153 = tpu.strided_load %arg11[%c290, %c0_153] {strides = array<i32: 2, 1>} : memref<324x32xf32, #tpu.memory_space<vmem>>, vector<8x32xf32>
    %154 = tpu.concatenate %146, %147, %148, %149, %150, %151, %152, %153 in 0 : vector<8x32xf32>, vector<8x32xf32>, vector<8x32xf32>, vector<8x32xf32>, vector<8x32xf32>, vector<8x32xf32>, vector<8x32xf32>, vector<8x32xf32> -> vector<64x32xf32>
    %155 = arith.truncf %154 : vector<64x32xf32> to vector<64x32xbf16>
    %c256 = arith.constant 256 : index
    %c0_154 = arith.constant 0 : index
    %156 = vector.load %arg4[%c256, %c0_154] : memref<288x32xbf16, #tpu.memory_space<vmem>>, vector<32x32xbf16>
    %cst_155 = arith.constant dense<0.000000e+00> : vector<64x32xf32>
    %157 = tpu.matmul %155, %156, %cst_155 {dimension_numbers = #tpu.dot_dimension_numbers<[1], [0], [0], [1], [0, 0, 1, 1], [], []>} : vector<64x32xbf16>, vector<32x32xbf16>, vector<64x32xf32> -> vector<64x32xf32>
    %158 = arith.addf %145, %157 : vector<64x32xf32>
    %c0_156 = arith.constant 0 : index
    %c0_157 = arith.constant 0 : index
    %159 = vector.load %arg5[%c0_156, %c0_157] : memref<1x32xf32, #tpu.memory_space<vmem>>, vector<1x32xf32>
    %160 = vector.broadcast %159 : vector<1x32xf32> to vector<64x32xf32>
    %161 = arith.addf %158, %160 : vector<64x32xf32>
    %cst_158 = arith.constant 0.000000e+00 : f32
    %162 = vector.broadcast %cst_158 : f32 to vector<64x32xf32>
    %163 = arith.maximumf %161, %162 : vector<64x32xf32>
    %164 = arith.truncf %163 : vector<64x32xf32> to vector<64x32xbf16>
    %c0_159 = arith.constant 0 : index
    %c0_160 = arith.constant 0 : index
    %165 = vector.load %arg6[%c0_159, %c0_160] : memref<32x128xbf16, #tpu.memory_space<vmem>>, vector<32x128xbf16>
    %cst_161 = arith.constant dense<0.000000e+00> : vector<64x128xf32>
    %166 = tpu.matmul %164, %165, %cst_161 {dimension_numbers = #tpu.dot_dimension_numbers<[1], [0], [0], [1], [0, 0, 1, 1], [], []>} : vector<64x32xbf16>, vector<32x128xbf16>, vector<64x128xf32> -> vector<64x128xf32>
    %c0_162 = arith.constant 0 : index
    %c0_163 = arith.constant 0 : index
    %167 = vector.load %arg7[%c0_162, %c0_163] : memref<1x128xf32, #tpu.memory_space<vmem>>, vector<1x128xf32>
    %168 = vector.broadcast %167 : vector<1x128xf32> to vector<64x128xf32>
    %169 = arith.addf %166, %168 : vector<64x128xf32>
    %170 = arith.extf %1 : vector<256x32xbf16> to vector<256x32xf32>
    %c0_164 = arith.constant 0 : index
    %c0_165 = arith.constant 0 : index
    %171 = vector.load %arg12[%c0_164, %c0_165] : memref<256x32xf32, #tpu.memory_space<vmem>>, vector<256x32xf32>
    tpu.vector_store %arg12[%c0_164, %c0_165], %170 {strides = array<i32>} : memref<256x32xf32, #tpu.memory_space<vmem>>, vector<256x32xf32>,
    %c0_166 = arith.constant 0 : index
    %c0_167 = arith.constant 0 : index
    %172 = tpu.strided_load %arg12[%c0_166, %c0_167] {strides = array<i32: 2, 1>} : memref<256x32xf32, #tpu.memory_space<vmem>>, vector<8x32xf32>
    %c32_168 = arith.constant 32 : index
    %c0_169 = arith.constant 0 : index
    %173 = tpu.strided_load %arg12[%c32_168, %c0_169] {strides = array<i32: 2, 1>} : memref<256x32xf32, #tpu.memory_space<vmem>>, vector<8x32xf32>
    %c64_170 = arith.constant 64 : index
    %c0_171 = arith.constant 0 : index
    %174 = tpu.strided_load %arg12[%c64_170, %c0_171] {strides = array<i32: 2, 1>} : memref<256x32xf32, #tpu.memory_space<vmem>>, vector<8x32xf32>
    %c96_172 = arith.constant 96 : index
    %c0_173 = arith.constant 0 : index
    %175 = tpu.strided_load %arg12[%c96_172, %c0_173] {strides = array<i32: 2, 1>} : memref<256x32xf32, #tpu.memory_space<vmem>>, vector<8x32xf32>
    %c128_174 = arith.constant 128 : index
    %c0_175 = arith.constant 0 : index
    %176 = tpu.strided_load %arg12[%c128_174, %c0_175] {strides = array<i32: 2, 1>} : memref<256x32xf32, #tpu.memory_space<vmem>>, vector<8x32xf32>
    %c160_176 = arith.constant 160 : index
    %c0_177 = arith.constant 0 : index
    %177 = tpu.strided_load %arg12[%c160_176, %c0_177] {strides = array<i32: 2, 1>} : memref<256x32xf32, #tpu.memory_space<vmem>>, vector<8x32xf32>
    %c192_178 = arith.constant 192 : index
    %c0_179 = arith.constant 0 : index
    %178 = tpu.strided_load %arg12[%c192_178, %c0_179] {strides = array<i32: 2, 1>} : memref<256x32xf32, #tpu.memory_space<vmem>>, vector<8x32xf32>
    %c224_180 = arith.constant 224 : index
    %c0_181 = arith.constant 0 : index
    %179 = tpu.strided_load %arg12[%c224_180, %c0_181] {strides = array<i32: 2, 1>} : memref<256x32xf32, #tpu.memory_space<vmem>>, vector<8x32xf32>
    %180 = tpu.concatenate %172, %173, %174, %175, %176, %177, %178, %179 in 0 : vector<8x32xf32>, vector<8x32xf32>, vector<8x32xf32>, vector<8x32xf32>, vector<8x32xf32>, vector<8x32xf32>, vector<8x32xf32>, vector<8x32xf32> -> vector<64x32xf32>
    %181 = arith.truncf %180 : vector<64x32xf32> to vector<64x32xbf16>
    %c0_182 = arith.constant 0 : index
    %c0_183 = arith.constant 0 : index
    %182 = vector.load %arg8[%c0_182, %c0_183] : memref<32x128xbf16, #tpu.memory_space<vmem>>, vector<32x128xbf16>
    %cst_184 = arith.constant dense<0.000000e+00> : vector<64x128xf32>
    %183 = tpu.matmul %181, %182, %cst_184 {dimension_numbers = #tpu.dot_dimension_numbers<[1], [0], [0], [1], [0, 0, 1, 1], [], []>} : vector<64x32xbf16>, vector<32x128xbf16>, vector<64x128xf32> -> vector<64x128xf32>
    %c0_185 = arith.constant 0 : index
    %c0_186 = arith.constant 0 : index
    %184 = vector.load %arg9[%c0_185, %c0_186] : memref<1x128xf32, #tpu.memory_space<vmem>>, vector<1x128xf32>
    %185 = vector.broadcast %184 : vector<1x128xf32> to vector<64x128xf32>
    %186 = arith.addf %183, %185 : vector<64x128xf32>
    %187 = arith.addf %169, %186 : vector<64x128xf32>
    %cst_187 = arith.constant 0.000000e+00 : f32
    %188 = vector.broadcast %cst_187 : f32 to vector<64x128xf32>
    %189 = arith.maximumf %187, %188 : vector<64x128xf32>
    %190 = arith.truncf %189 : vector<64x128xf32> to vector<64x128xbf16>
    %c0_188 = arith.constant 0 : index
    %c0_189 = arith.constant 0 : index
    %c0_190 = arith.constant 0 : index
    %191 = vector.load %arg10[%c0_188, %c0_189, %c0_190] : memref<1x64x128xbf16, #tpu.memory_space<vmem>>, vector<1x64x128xbf16>
    %192 = vector.shape_cast %191 : vector<1x64x128xbf16> to vector<64x128xbf16>
    %193 = vector.shape_cast %190 : vector<64x128xbf16> to vector<1x64x128xbf16>
    tpu.vector_store %arg10[%c0_188, %c0_189, %c0_190], %193 {strides = array<i32>} : memref<1x64x128xbf16, #tpu.memory_space<vmem>>, vector<1x64x128xbf16>,
    return
  }
  func.func @transform_0(%arg0: i32) -> (i32, i32, i32) {
    %c0_i32 = arith.constant 0 : i32
    %c0_i32_0 = arith.constant 0 : i32
    %c0_i32_1 = arith.constant 0 : i32
    return %arg0, %c0_i32, %c0_i32_0 : i32, i32, i32
  }
  func.func @transform_1(%arg0: i32) -> (i32, i32) {
    %c0_i32 = arith.constant 0 : i32
    %c0_i32_0 = arith.constant 0 : i32
    %c0_i32_1 = arith.constant 0 : i32
    return %c0_i32, %c0_i32_0 : i32, i32
  }
  func.func @transform_2(%arg0: i32) -> (i32, i32) {
    %c0_i32 = arith.constant 0 : i32
    %c0_i32_0 = arith.constant 0 : i32
    %c0_i32_1 = arith.constant 0 : i32
    return %c0_i32, %c0_i32_0 : i32, i32
  }
  func.func @transform_3(%arg0: i32) -> (i32, i32) {
    %c0_i32 = arith.constant 0 : i32
    %c0_i32_0 = arith.constant 0 : i32
    %c0_i32_1 = arith.constant 0 : i32
    return %c0_i32, %c0_i32_0 : i32, i32
  }
  func.func @transform_4(%arg0: i32) -> (i32, i32) {
    %c0_i32 = arith.constant 0 : i32
    %c0_i32_0 = arith.constant 0 : i32
    %c0_i32_1 = arith.constant 0 : i32
    return %c0_i32, %c0_i32_0 : i32, i32
  }
  func.func @transform_5(%arg0: i32) -> (i32, i32) {
    %c0_i32 = arith.constant 0 : i32
    %c0_i32_0 = arith.constant 0 : i32
    %c0_i32_1 = arith.constant 0 : i32
    return %c0_i32, %c0_i32_0 : i32, i32
  }
  func.func @transform_6(%arg0: i32) -> (i32, i32) {
    %c0_i32 = arith.constant 0 : i32
    %c0_i32_0 = arith.constant 0 : i32
    %c0_i32_1 = arith.constant 0 : i32
    return %c0_i32, %c0_i32_0 : i32, i32
  }
  func.func @transform_7(%arg0: i32) -> (i32, i32) {
    %c0_i32 = arith.constant 0 : i32
    %c0_i32_0 = arith.constant 0 : i32
    %c0_i32_1 = arith.constant 0 : i32
    return %c0_i32, %c0_i32_0 : i32, i32
  }
  func.func @transform_8(%arg0: i32) -> (i32, i32) {
    %c0_i32 = arith.constant 0 : i32
    %c0_i32_0 = arith.constant 0 : i32
    %c0_i32_1 = arith.constant 0 : i32
    return %c0_i32, %c0_i32_0 : i32, i32
  }
  func.func @transform_9(%arg0: i32) -> (i32, i32, i32) {
    %c0_i32 = arith.constant 0 : i32
    %c0_i32_0 = arith.constant 0 : i32
    %c0_i32_1 = arith.constant 0 : i32
    return %arg0, %c0_i32, %c0_i32_0 : i32, i32, i32
  }
}

</mosaic_0001>

<bundles_post_ra>
// kernel: _lambda_.1
= control target key start
LH: loop header
LB: loop body
LE: loop exit
PB: predicated region body
PF: predicated region fallthrough
CT: control target
= control target key end

     0   :  { %s2860_s30 = smov 0   ;;  %s3288_s0 = inlined_call_operand.vmem [shape: bf16[2,256,32], index: 0, kind: input, shape index: {}]   ;;  %s3289_s1 = inlined_call_operand.vmem [shape: bf16[32,32], index: 1, kind: input, shape index: {}]   ;;  %s3290_s2 = inlined_call_operand.vmem [shape: f32[1,32], index: 2, kind: input, shape index: {}]   ;;  %s3291_s3 = inlined_call_operand.vmem [shape: bf16[288,32], index: 3, kind: input, shape index: {}]   ;;  %s3292_s4 = inlined_call_operand.vmem [shape: f32[1,32], index: 4, kind: input, shape index: {}]   ;;  %s3293_s5 = inlined_call_operand.vmem [shape: bf16[32,128], index: 5, kind: input, shape index: {}]   ;;  %s3294_s6 = inlined_call_operand.vmem [shape: f32[1,128], index: 6, kind: input, shape index: {}]   ;;  %s3295_s7 = inlined_call_operand.vmem [shape: bf16[32,128], index: 7, kind: input, shape index: {}]   ;;  %s3296_s8 = inlined_call_operand.vmem [shape: f32[1,128], index: 8, kind: input, shape index: {}]   ;;  %s3297_s9 = inlined_call_operand.vmem [shape: bf16[2,64,128], index: 9, kind: output, shape index: {}]  }
   0x1 LB: > { %s2236_s10 = sadd.s32 4294967295, %s2807_s30   ;;  %p2240_p0 = scmp.ge.s32.totalorder %s2807_s30, 1  ;;  %s2807_s30 = sphi %s2860_s30, %s19_s30  }
   0x2   : > { %p287_p1 = scmp.lt.s32.totalorder %s2807_s30, 3 }
   0x4   : > { %p288_p2 = pnand %p2240_p0, %p287_p1 }
   0x5   : > { %v2745_v0 = vld [vmem:[%s3289_s1] sm:$0xff] (!%p288_p2)   ;;  %p323_p3 = scmp.lt.s32.totalorder (!%p288_p2), %s2236_s10, 1  ;;  %v2746_v1 = vld [vmem:[%s3289_s1 + $0x8] sm:$0xff] (!%p288_p2)   ;;  %vm469_vm0 = vcmask (!%p288_p2), 261120   ;;  %v2809_v34 = vmov (!%p288_p2), 0.0   ;;  %v2763_v35 = vld [vmem:[%s3291_s3 + $0x10] sm:$0xff] (!%p288_p2)  }
   0x6   : > { %291 = sbr.rel (%p288_p2) target bundleno = 868 (0x364), region = 56  ;;  %2476 = vmatprep.subr.bf16.mxu0 (!%p288_p2), %v2745_v0  ;;  %715 = vst.msk [vmem:[#allocation2 + $0x20] sm:$0xff] (!%p288_p2), %vm469_vm0, %v2809_v34  ;;  %716 = vst.msk [vmem:[#allocation2 + $0x28] sm:$0xff] (!%p288_p2), %vm469_vm0, %v2809_v34  ;;  %v2764_v36 = vld [vmem:[%s3291_s3 + $0x18] sm:$0xff] (!%p288_p2)   ;;  %v2978_v37 = vld [vmem:[%s3291_s3] sm:$0xff] (!%p288_p2)  }
   0x7   : > { %2477 = vmatpush3.bf16.msra.mxu0 (!%p288_p2), %v2745_v0  ;;  %711 = vst.msk [vmem:[#allocation2] sm:$0xff] (!%p288_p2), %vm469_vm0, %v2809_v34  ;;  %712 = vst.msk [vmem:[#allocation2 + $0x8] sm:$0xff] (!%p288_p2), %vm469_vm0, %v2809_v34  ;;  %2644 = vmatprep.subr.bf16.mxu1 (!%p288_p2), %v2978_v37  ;;  %v2986_v38 = vld [vmem:[%s3291_s3 + $0x8] sm:$0xff] (!%p288_p2)   ;;  %v2993_v39 = vld [vmem:[%s3291_s3 + $0x20] sm:$0xff] (!%p288_p2)  }
   0x8   : > { %2478 = vmatprep.subr.bf16.mxu0 (!%p288_p2), %v2746_v1  ;;  %713 = vst.msk [vmem:[#allocation2 + $0x10] sm:$0xff] (!%p288_p2), %vm469_vm0, %v2809_v34  ;;  %714 = vst.msk [vmem:[#allocation2 + $0x18] sm:$0xff] (!%p288_p2), %vm469_vm0, %v2809_v34  ;;  %2646 = vmatpush3.bf16.msra.mxu1 (!%p288_p2), %v2978_v37  ;;  %v2999_v40 = vld [vmem:[%s3290_s2] ss:$0 sm:$0xff] (!%p288_p2) }
   0x9   : > { %717 = vst.msk [vmem:[#allocation2 + $0x30] sm:$0xff] (!%p288_p2), %vm469_vm0, %v2809_v34  ;;  %718 = vst.msk [vmem:[#allocation2 + $0x38] sm:$0xff] (!%p288_p2), %vm469_vm0, %v2809_v34  ;;  %2645 = vmatprep.subr.bf16.mxu1 (!%p288_p2), %v2986_v38 }
   0xa   : > { %719 = vst.msk [vmem:[#allocation2 + $0x40] sm:$0xff] (!%p288_p2), %vm469_vm0, %v2809_v34  ;;  %720 = vst.msk [vmem:[#allocation2 + $0x48] sm:$0xff] (!%p288_p2), %vm469_vm0, %v2809_v34 }
   0xb   : > { %2479 = vmatpush3.bf16.msra.mxu0 (!%p288_p2), %v2746_v1  ;;  %721 = vst.msk [vmem:[#allocation2 + $0x50] sm:$0xff] (!%p288_p2), %vm469_vm0, %v2809_v34  ;;  %722 = vst.msk [vmem:[#allocation2 + $0x58] sm:$0xff] (!%p288_p2), %vm469_vm0, %v2809_v34 }
   0xc   : > { %723 = vst.msk [vmem:[#allocation2 + $0x60] sm:$0xff] (!%p288_p2), %vm469_vm0, %v2809_v34  ;;  %724 = vst.msk [vmem:[#allocation2 + $0x68] sm:$0xff] (!%p288_p2), %vm469_vm0, %v2809_v34  ;;  %2512 = vmatprep.subr.bf16.mxu0 (!%p288_p2), %v2763_v35  ;;  %2647 = vmatpush3.bf16.msra.mxu1 (!%p288_p2), %v2986_v38 }
   0xd   : > { %s3299_s10 = smov (!%p323_p3, %s2236_s10), 1  ;;  %725 = vst.msk [vmem:[#allocation2 + $0x70] sm:$0xff] %vm469_vm0, %v2809_v34  ;;  %726 = vst.msk [vmem:[#allocation2 + $0x78] sm:$0xff] %vm469_vm0, %v2809_v34  ;;  %2536 = vmatprep.subr.bf16.mxu1 %v2993_v39 }
   0xe   : > { %s2359_s15 = sshll.u32 %s3299_s10, 7  ;;  %727 = vst.msk [vmem:[#allocation2 + $0x80] sm:$0xff] %vm469_vm0, %v2809_v34  ;;  %728 = vst.msk [vmem:[#allocation2 + $0x88] sm:$0xff] %vm469_vm0, %v2809_v34  ;;  %v809_v63 = vld [vmem:[#allocation2 + $0x1] ss:$2 sm:$0xff]  ;;  %s2360_s14 = sshll.u32 %s3299_s10, 5 }
   0xf   : > { %s2880_s18 = scalar_lea.vmem %s3288_s0, %s2359_s15  ;;  %729 = vst.msk [vmem:[#allocation2 + $0x90] sm:$0xff] %vm469_vm0, %v2809_v34  ;;  %730 = vst.msk [vmem:[#allocation2 + $0x98] sm:$0xff] %vm469_vm0, %v2809_v34  ;;  %s332_s17 = scalar_lea.vmem %s3297_s9, %s2360_s14 }
  0x10   : > { %v334_v2 = vld [vmem:[%s2880_s18] sm:$0xff]   ;;  %v336_v3 = vld [vmem:[%s2880_s18 + $0x8] sm:$0xff]   ;;  %v338_v4 = vld [vmem:[%s2880_s18 + $0x10] sm:$0xff]   ;;  %731 = vst.msk [vmem:[#allocation2 + $0xa0] sm:$0xff] %vm469_vm0, %v2809_v34 }
  0x11   : > { %v1942_v5 = vunpack.c.l.bf16 %v334_v2  ;;  %v1943_v6 = vunpack.c.h.bf16 %v334_v2  ;;  %v1946_v7 = vunpack.c.l.bf16 %v338_v4  ;;  %v340_v8 = vld [vmem:[%s2880_s18 + $0x18] sm:$0xff]   ;;  %2480 = vmatprep.mubr.msk.bf16.mxu0 %vm469_vm0, %v334_v2  ;;  %v1947_v9 = vunpack.c.h.bf16 %v338_v4  ;;  %v342_v10 = vld [vmem:[%s2880_s18 + $0x20] sm:$0xff]   ;;  %v344_v11 = vld [vmem:[%s2880_s18 + $0x28] sm:$0xff]   ;;  %732 = vst.msk [vmem:[#allocation2 + $0xa8] sm:$0xff] %vm469_vm0, %v2809_v34 }
  0x12   : > { %2481 = vmatmul.mubr.msk.bf16.vlgmr.msra.gmra.mrb[0].mxu0 %vm469_vm0, %v336_v3  ;;  %v1950_v12 = vunpack.c.l.bf16 %v342_v10  ;;  %v1951_v13 = vunpack.c.h.bf16 %v342_v10  ;;  %v346_v14 = vld [vmem:[%s2880_s18 + $0x30] sm:$0xff]   ;;  %v348_v15 = vld [vmem:[%s2880_s18 + $0x38] sm:$0xff]   ;;  %v350_v16 = vld [vmem:[%s2880_s18 + $0x40] sm:$0xff]   ;;  %733 = vst.msk [vmem:[#allocation2 + $0xb0] sm:$0xff] %vm469_vm0, %v2809_v34 }
  0x13   : > { %1974 = vst.msk [vmem:[#allocation3] sm:$0xff] %vm469_vm0, %v1942_v5  ;;  %1975 = vst.msk [vmem:[#allocation3 + $0x8] sm:$0xff] %vm469_vm0, %v1943_v6  ;;  %2484 = vmatprep.mubr.msk.bf16.mxu0 %vm469_vm0, %v338_v4  ;;  %v1954_v17 = vunpack.c.l.bf16 %v346_v14  ;;  %v352_v18 = vld [vmem:[%s2880_s18 + $0x48] sm:$0xff]   ;;  %v354_v19 = vld [vmem:[%s2880_s18 + $0x50] sm:$0xff]   ;;  %v1955_v20 = vunpack.c.h.bf16 %v346_v14  ;;  %v1958_v22 = vunpack.c.l.bf16 %v350_v16  ;;  %v1959_v23 = vunpack.c.h.bf16 %v350_v16  ;;  %2513 = vmatpush3.bf16.msra.mxu0 %v2763_v35 }
  0x14   : > { %1978 = vst.msk [vmem:[#allocation3 + $0x20] sm:$0xff] %vm469_vm0, %v1946_v7  ;;  %1979 = vst.msk [vmem:[#allocation3 + $0x28] sm:$0xff] %vm469_vm0, %v1947_v9  ;;  %v356_v21 = vld [vmem:[%s2880_s18 + $0x58] sm:$0xff]   ;;  %v358_v24 = vld [vmem:[%s2880_s18 + $0x60] sm:$0xff]   ;;  %v1962_v25 = vunpack.c.l.bf16 %v354_v19  ;;  %v1963_v28 = vunpack.c.h.bf16 %v354_v19  ;;  %2514 = vmatprep.subr.bf16.mxu0 %v2764_v36 }
  0x15   : > { %1982 = vst.msk [vmem:[#allocation3 + $0x40] sm:$0xff] %vm469_vm0, %v1950_v12  ;;  %1983 = vst.msk [vmem:[#allocation3 + $0x48] sm:$0xff] %vm469_vm0, %v1951_v13  ;;  %v360_v26 = vld [vmem:[%s2880_s18 + $0x68] sm:$0xff]   ;;  %v362_v27 = vld [vmem:[%s2880_s18 + $0x70] sm:$0xff]   ;;  %v1966_v30 = vunpack.c.l.bf16 %v358_v24  ;;  %v1967_v31 = vunpack.c.h.bf16 %v358_v24 }
  0x16   : > { %1986 = vst.msk [vmem:[#allocation3 + $0x60] sm:$0xff] %vm469_vm0, %v1954_v17  ;;  %1987 = vst.msk [vmem:[#allocation3 + $0x68] sm:$0xff] %vm469_vm0, %v1955_v20  ;;  %v364_v29 = vld [vmem:[%s2880_s18 + $0x78] sm:$0xff]   ;;  %v1970_v32 = vunpack.c.l.bf16 %v362_v27  ;;  %v1971_v33 = vunpack.c.h.bf16 %v362_v27 }
  0x17   : > { %1990 = vst.msk [vmem:[#allocation3 + $0x80] sm:$0xff] %vm469_vm0, %v1958_v22  ;;  %1991 = vst.msk [vmem:[#allocation3 + $0x88] sm:$0xff] %vm469_vm0, %v1959_v23  ;;  %2515 = vmatpush3.bf16.msra.mxu0 %v2764_v36 }
  0x18   : > { %1994 = vst.msk [vmem:[#allocation3 + $0xa0] sm:$0xff] %vm469_vm0, %v1962_v25  ;;  %1995 = vst.msk [vmem:[#allocation3 + $0xa8] sm:$0xff] %vm469_vm0, %v1963_v28  ;;  %2524 = vmatprep.subr.bf16.mxu0 %v2978_v37 }
  0x19   : > { %1998 = vst.msk [vmem:[#allocation3 + $0xc0] sm:$0xff] %vm469_vm0, %v1966_v30  ;;  %1999 = vst.msk [vmem:[#allocation3 + $0xc8] sm:$0xff] %vm469_vm0, %v1967_v31 }
  0x1a   : > { %2485 = vmatmul.mubr.msk.bf16.gmra.mrb[4].mxu0 %vm469_vm0, %v340_v8  ;;  %2002 = vst.msk [vmem:[#allocation3 + $0xe0] sm:$0xff] %vm469_vm0, %v1970_v32  ;;  %2003 = vst.msk [vmem:[#allocation3 + $0xe8] sm:$0xff] %vm469_vm0, %v1971_v33 }
  0x1b   : > { %2488 = vmatprep.mubr.msk.bf16.mxu0 %vm469_vm0, %v342_v10  ;;  %734 = vst.msk [vmem:[#allocation2 + $0xb8] sm:$0xff] %vm469_vm0, %v2809_v34  ;;  %735 = vst.msk [vmem:[#allocation2 + $0xc0] sm:$0xff] %vm469_vm0, %v2809_v34 }
  0x1c   : > { %736 = vst.msk [vmem:[#allocation2 + $0xc8] sm:$0xff] %vm469_vm0, %v2809_v34  ;;  %737 = vst.msk [vmem:[#allocation2 + $0xd0] sm:$0xff] %vm469_vm0, %v2809_v34 }
  0x1d   : > { %738 = vst.msk [vmem:[#allocation2 + $0xd8] sm:$0xff] %vm469_vm0, %v2809_v34  ;;  %739 = vst.msk [vmem:[#allocation2 + $0xe0] sm:$0xff] %vm469_vm0, %v2809_v34 }
  0x1e   : > { %740 = vst.msk [vmem:[#allocation2 + $0xe8] sm:$0xff] %vm469_vm0, %v2809_v34  ;;  %741 = vst.msk [vmem:[#allocation2 + $0xf0] sm:$0xff] %vm469_vm0, %v2809_v34 }
  0x1f   : > { %742 = vst.msk [vmem:[#allocation2 + $0xf8] sm:$0xff] %vm469_vm0, %v2809_v34  ;;  %743 = vst.msk [vmem:[#allocation2 + $0x100] sm:$0xff] %vm469_vm0, %v2809_v34 }
  0x20   : > { %744 = vst.msk [vmem:[#allocation2 + $0x108] sm:$0xff] %vm469_vm0, %v2809_v34  ;;  %745 = vst.msk [vmem:[#allocation2 + $0x110] sm:$0xff] %vm469_vm0, %v2809_v34 }
  0x21   : > { %746 = vst.msk [vmem:[#allocation2 + $0x118] sm:$0xff] %vm469_vm0, %v2809_v34  ;;  %747 = vst.msk [vmem:[#allocation2 + $0x120] sm:$0xff] %vm469_vm0, %v2809_v34 }
  0x22   : > { %2489 = vmatmul.mubr.msk.bf16.gmra.mrb[8].mxu0 %vm469_vm0, %v344_v11  ;;  %748 = vst.msk [vmem:[#allocation2 + $0x128] sm:$0xff] %vm469_vm0, %v2809_v34  ;;  %749 = vst.msk [vmem:[#allocation2 + $0x130] sm:$0xff] %vm469_vm0, %v2809_v34 }
  0x23   : > { %2492 = vmatprep.mubr.msk.bf16.mxu0 %vm469_vm0, %v346_v14 }
  0x2a   : > { %2493 = vmatmul.mubr.msk.bf16.gmra.mrb[12].mxu0 %vm469_vm0, %v348_v15 }
  0x2b   : > { %2496 = vmatprep.mubr.msk.bf16.mxu0 %vm469_vm0, %v350_v16 }
  0x32   : > { %2497 = vmatmul.mubr.msk.bf16.gmra.mrb[16].mxu0 %vm469_vm0, %v352_v18 }
  0x33   : > { %2500 = vmatprep.mubr.msk.bf16.mxu0 %vm469_vm0, %v354_v19 }
  0x3a   : > { %2501 = vmatmul.mubr.msk.bf16.gmra.mrb[20].mxu0 %vm469_vm0, %v356_v21 }
  0x3b   : > { %2504 = vmatprep.mubr.msk.bf16.mxu0 %vm469_vm0, %v358_v24 }
  0x42   : > { %2505 = vmatmul.mubr.msk.bf16.gmra.mrb[24].mxu0 %vm469_vm0, %v360_v26 }
  0x43   : > { %2508 = vmatprep.mubr.msk.bf16.mxu0 %vm469_vm0, %v362_v27 }
  0x4a   : > { %2509 = vmatmul.mubr.msk.bf16.gmra.mrb[28].mxu0 %vm469_vm0, %v364_v29 }
  0xe5   : > { %v2482_v41 = vpop.f32.mrb[0].mxu0 }
  0xe6   : > { %v561_v42 = vadd.f32 %v2482_v41, %v2999_v40  ;;  %v552_v43 = vpop.f32.mrb[1].mxu0 }
  0xe7   : > { %v553_v44 = vadd.f32 %v2999_v40, %v552_v43  ;;  %v2483_v45 = vpop.f32.mrb[2].mxu0 }
  0xe8   : > { %v681_v46 = vmax.f32 %v561_v42, 0.0  ;;  %v564_v47 = vadd.f32 %v2483_v45, %v2999_v40  ;;  %v555_v48 = vpop.f32.mrb[3].mxu0 }
  0xe9   : > { %v679_v49 = vmax.f32 %v553_v44, 0.0  ;;  %v556_v50 = vadd.f32 %v2999_v40, %v555_v48 }
  0xea   : > { %755 = vst.msk [vmem:[#allocation2 + $0x25] sm:$0xff] %vm469_vm0, %v681_v46  ;;  %v682_v51 = vmax.f32 %v564_v47, 0.0 }
  0xeb   : > { %753 = vst.msk [vmem:[#allocation2 + $0x13] sm:$0xff] %vm469_vm0, %v679_v49  ;;  %v680_v52 = vmax.f32 %v556_v50, 0.0 }
  0xec   : > { %756 = vst.msk [vmem:[#allocation2 + $0x2d] sm:$0xff] %vm469_vm0, %v682_v51 }
  0xed   : > { %754 = vst.msk [vmem:[#allocation2 + $0x1b] sm:$0xff] %vm469_vm0, %v680_v52  ;;  %v2486_v53 = vpop.f32.mrb[4].mxu0 }
  0xee   : > { %v577_v54 = vadd.f32 %v2486_v53, %v2999_v40  ;;  %v568_v55 = vpop.f32.mrb[5].mxu0 }
  0xef   : > { %v569_v56 = vadd.f32 %v2999_v40, %v568_v55  ;;  %v2487_v57 = vpop.f32.mrb[6].mxu0 }
  0xf0   : > { %v685_v58 = vmax.f32 %v577_v54, 0.0  ;;  %v580_v59 = vadd.f32 %v2487_v57, %v2999_v40  ;;  %v571_v60 = vpop.f32.mrb[7].mxu0 }
  0xf1   : > { %v683_v61 = vmax.f32 %v569_v56, 0.0  ;;  %v572_v62 = vadd.f32 %v2999_v40, %v571_v60 }
  0xf2   : > { %759 = vst.msk [vmem:[#allocation2 + $0x49] sm:$0xff] %vm469_vm0, %v685_v58  ;;  %v686_v0 = vmax.f32 %v580_v59, 0.0 }
  0xf3   : > { %757 = vst.msk [vmem:[#allocation2 + $0x37] sm:$0xff] %vm469_vm0, %v683_v61  ;;  %v684_v1 = vmax.f32 %v572_v62, 0.0  ;;  %v3015_v2 = vld [vmem:[#allocation2 + $0x25] ss:$2 sm:$0xff]  ;;  %v3030_v17 = vld [vmem:[#allocation2 + $0x26] ss:$2 sm:$0xff] }
  0xf4   : > { %760 = vst.msk [vmem:[#allocation2 + $0x51] sm:$0xff] %vm469_vm0, %v686_v0  ;;  %v824_v3 = vpack.c.bf16 %v3015_v2, %v809_v63 }
  0xf5   : > { %758 = vst.msk [vmem:[#allocation2 + $0x3f] sm:$0xff] %vm469_vm0, %v684_v1  ;;  %v2490_v4 = vpop.f32.mrb[8].mxu0 }
  0xf6   : > { %v593_v5 = vadd.f32 %v2490_v4, %v2999_v40  ;;  %v584_v6 = vpop.f32.mrb[9].mxu0  ;;  %2516 = vmatprep.mubr.msk.bf16.mxu0 %vm469_vm0, %v824_v3 }
  0xf7   : > { %v585_v7 = vadd.f32 %v2999_v40, %v584_v6  ;;  %v2491_v8 = vpop.f32.mrb[10].mxu0 }
  0xf8   : > { %v689_v9 = vmax.f32 %v593_v5, 0.0  ;;  %v596_v10 = vadd.f32 %v2491_v8, %v2999_v40  ;;  %v587_v11 = vpop.f32.mrb[11].mxu0 }
  0xf9   : > { %v687_v12 = vmax.f32 %v585_v7, 0.0  ;;  %v588_v13 = vadd.f32 %v2999_v40, %v587_v11 }
  0xfa   : > { %763 = vst.msk [vmem:[#allocation2 + $0x6d] sm:$0xff] %vm469_vm0, %v689_v9  ;;  %v690_v14 = vmax.f32 %v596_v10, 0.0 }
  0xfb   : > { %761 = vst.msk [vmem:[#allocation2 + $0x5b] sm:$0xff] %vm469_vm0, %v687_v12  ;;  %v688_v15 = vmax.f32 %v588_v13, 0.0  ;;  %v3027_v16 = vld [vmem:[#allocation2 + $0x49] ss:$2 sm:$0xff]  ;;  %v3032_v18 = vld [vmem:[#allocation2 + $0x4a] ss:$2 sm:$0xff] }
  0xfc   : > { %764 = vst.msk [vmem:[#allocation2 + $0x75] sm:$0xff] %vm469_vm0, %v690_v14  ;;  %v1603_v19 = vpack.c.bf16 %v3027_v16, %v3015_v2  ;;  %v1710_v21 = vpack.c.bf16 %v3032_v18, %v3030_v17 }
  0xfd   : > { %762 = vst.msk [vmem:[#allocation2 + $0x63] sm:$0xff] %vm469_vm0, %v688_v15  ;;  %v2494_v20 = vpop.f32.mrb[12].mxu0 }
  0xfe   : > { %v609_v22 = vadd.f32 %v2494_v20, %v2999_v40  ;;  %v600_v23 = vpop.f32.mrb[13].mxu0 }
  0xff   : > { %v601_v24 = vadd.f32 %v2999_v40, %v600_v23  ;;  %v2495_v25 = vpop.f32.mrb[14].mxu0 }
 0x100   : > { %v693_v26 = vmax.f32 %v609_v22, 0.0  ;;  %v612_v27 = vadd.f32 %v2495_v25, %v2999_v40  ;;  %v603_v28 = vpop.f32.mrb[15].mxu0 }
 0x101   : > { %v691_v29 = vmax.f32 %v601_v24, 0.0  ;;  %v604_v30 = vadd.f32 %v2999_v40, %v603_v28 }
 0x102   : > { %767 = vst.msk [vmem:[#allocation2 + $0x91] sm:$0xff] %vm469_vm0, %v693_v26  ;;  %v694_v31 = vmax.f32 %v612_v27, 0.0 }
 0x103   : > { %765 = vst.msk [vmem:[#allocation2 + $0x7f] sm:$0xff] %vm469_vm0, %v691_v29  ;;  %v692_v32 = vmax.f32 %v604_v30, 0.0  ;;  %v3045_v33 = vld [vmem:[#allocation2 + $0x6d] ss:$2 sm:$0xff]  ;;  %v3059_v50 = vld [vmem:[#allocation2 + $0x6c] ss:$2 sm:$0xff] }
 0x104   : > { %768 = vst.msk [vmem:[#allocation2 + $0x99] sm:$0xff] %vm469_vm0, %v694_v31  ;;  %v825_v34 = vpack.c.bf16 %v3045_v33, %v3027_v16  ;;  %v3072_v55 = vld [vmem:[#allocation2 + $0x6e] ss:$2 sm:$0xff] }
 0x105   : > { %766 = vst.msk [vmem:[#allocation2 + $0x87] sm:$0xff] %vm469_vm0, %v692_v32  ;;  %v2498_v35 = vpop.f32.mrb[16].mxu0 }
 0x106   : > { %v625_v36 = vadd.f32 %v2498_v35, %v2999_v40  ;;  %v616_v41 = vpop.f32.mrb[17].mxu0  ;;  %2517 = vmatmul.mubr.msk.bf16.vlgmr.msra.gmra.mrb[32].mxu0 %vm469_vm0, %v825_v34 }
 0x107   : > { %v617_v42 = vadd.f32 %v2999_v40, %v616_v41  ;;  %v2499_v43 = vpop.f32.mrb[18].mxu0  ;;  %2525 = vmatpush3.bf16.msra.mxu0 %v2978_v37 }
 0x108   : > { %v697_v44 = vmax.f32 %v625_v36, 0.0  ;;  %v628_v45 = vadd.f32 %v2499_v43, %v2999_v40  ;;  %v619_v46 = vpop.f32.mrb[19].mxu0  ;;  %2526 = vmatprep.subr.bf16.mxu0 %v2986_v38 }
 0x109   : > { %v695_v47 = vmax.f32 %v617_v42, 0.0  ;;  %v620_v48 = vadd.f32 %v2999_v40, %v619_v46 }
 0x10a   : > { %771 = vst.msk [vmem:[#allocation2 + $0xb5] sm:$0xff] %vm469_vm0, %v697_v44  ;;  %v698_v49 = vmax.f32 %v628_v45, 0.0 }
 0x10b   : > { %769 = vst.msk [vmem:[#allocation2 + $0xa3] sm:$0xff] %vm469_vm0, %v695_v47  ;;  %v696_v51 = vmax.f32 %v620_v48, 0.0  ;;  %v3062_v52 = vld [vmem:[#allocation2 + $0x91] ss:$2 sm:$0xff]  ;;  %v3064_v37 = vld [vmem:[#allocation2 + $0x90] ss:$2 sm:$0xff]  ;;  %2527 = vmatpush3.bf16.msra.mxu0 %v2986_v38 }
 0x10c   : > { %772 = vst.msk [vmem:[#allocation2 + $0xbd] sm:$0xff] %vm469_vm0, %v698_v49  ;;  %v1604_v53 = vpack.c.bf16 %v3062_v52, %v3045_v33  ;;  %v1497_v54 = vpack.c.bf16 %v3064_v37, %v3059_v50  ;;  %v3074_v56 = vld [vmem:[#allocation2 + $0x92] ss:$2 sm:$0xff] }
 0x10d   : > { %770 = vst.msk [vmem:[#allocation2 + $0xab] sm:$0xff] %vm469_vm0, %v696_v51  ;;  %v2502_v57 = vpop.f32.mrb[20].mxu0  ;;  %v1711_v58 = vpack.c.bf16 %v3074_v56, %v3072_v55  ;;  %v785_v49 = vld [vmem:[#allocation2] ss:$2 sm:$0xff] }
 0x10e   : > { %v641_v38 = vadd.f32 %v2502_v57, %v2999_v40  ;;  %v632_v59 = vpop.f32.mrb[21].mxu0  ;;  %v3124_v57 = vld [vmem:[#allocation2 + $0x24] ss:$2 sm:$0xff] }
 0x10f   : > { %v633_v60 = vadd.f32 %v2999_v40, %v632_v59  ;;  %v2503_v61 = vpop.f32.mrb[22].mxu0 }
 0x110   : > { %v701_v62 = vmax.f32 %v641_v38, 0.0  ;;  %v644_v63 = vadd.f32 %v2503_v61, %v2999_v40  ;;  %v635_v0 = vpop.f32.mrb[23].mxu0  ;;  %v1011_v38 = vld [vmem:[#allocation2 + $0x2] ss:$2 sm:$0xff] }
 0x111   : > { %v699_v1 = vmax.f32 %v633_v60, 0.0  ;;  %v636_v3 = vadd.f32 %v2999_v40, %v635_v0  ;;  %v800_v0 = vpack.c.bf16 %v3124_v57, %v785_v49  ;;  %v1257_v49 = vld [vmem:[#allocation2 + $0x5b] ss:$2 sm:$0xff] }
 0x112   : > { %775 = vst.msk [vmem:[#allocation2 + $0xd9] sm:$0xff] %vm469_vm0, %v701_v62  ;;  %v702_v4 = vmax.f32 %v644_v63, 0.0  ;;  %v2768_v63 = vld [vmem:[%s3291_s3 + $0x28] sm:$0xff]  }
 0x113   : > { %773 = vst.msk [vmem:[#allocation2 + $0xc7] sm:$0xff] %vm469_vm0, %v699_v1  ;;  %v700_v5 = vmax.f32 %v636_v3, 0.0  ;;  %v3085_v6 = vld [vmem:[#allocation2 + $0xb5] ss:$2 sm:$0xff]  ;;  %v3087_v7 = vld [vmem:[#allocation2 + $0xb4] ss:$2 sm:$0xff]  ;;  %v1026_v1 = vpack.c.bf16 %v3030_v17, %v1011_v38 }
 0x114   : > { %776 = vst.msk [vmem:[#allocation2 + $0xe1] sm:$0xff] %vm469_vm0, %v702_v4  ;;  %v826_v8 = vpack.c.bf16 %v3085_v6, %v3062_v52  ;;  %v802_v9 = vpack.c.bf16 %v3087_v7, %v3064_v37  ;;  %v3110_v30 = vld [vmem:[#allocation2 + $0xb6] ss:$2 sm:$0xff]  ;;  %v1261_v38 = vld [vmem:[#allocation2 + $0xa3] ss:$2 sm:$0xff] }
 0x115   : > { %774 = vst.msk [vmem:[#allocation2 + $0xcf] sm:$0xff] %vm469_vm0, %v700_v5  ;;  %v2506_v10 = vpop.f32.mrb[24].mxu0  ;;  %v2769_v3 = vld [vmem:[%s3291_s3 + $0x30] sm:$0xff]   ;;  %v2781_v17 = vld [vmem:[%s3293_s5] sm:$0xff]  }
 0x116   : > { %v657_v11 = vadd.f32 %v2506_v10, %v2999_v40  ;;  %v648_v12 = vpop.f32.mrb[25].mxu0  ;;  %2520 = vmatprep.mubr.msk.bf16.mxu0 %vm469_vm0, %v826_v8  ;;  %2532 = vmatprep.mubr.msk.bf16.mxu1 %vm469_vm0, %v802_v9  ;;  %v3150_v4 = vld [vmem:[#allocation2 + $0x48] ss:$2 sm:$0xff]  ;;  %v1027_v8 = vpack.c.bf16 %v3072_v55, %v3032_v18  ;;  %v1028_v9 = vpack.c.bf16 %v3110_v30, %v3074_v56  ;;  %v2771_v10 = vld [vmem:[%s3291_s3 + $0x40] sm:$0xff]  }
 0x117   : > { %v649_v13 = vadd.f32 %v2999_v40, %v648_v12  ;;  %v2507_v14 = vpop.f32.mrb[26].mxu0  ;;  %v801_v5 = vpack.c.bf16 %v3059_v50, %v3150_v4  ;;  %v1134_v12 = vld [vmem:[#allocation2 + $0x36] ss:$2 sm:$0xff]  ;;  %v2780_v50 = vld [vmem:[%s3291_s3 + $0x88] sm:$0xff]   ;;  %2620 = vmatprep.subr.bf16.mxu0 %v2781_v17 }
 0x118   : > { %v705_v15 = vmax.f32 %v657_v11, 0.0  ;;  %v660_v20 = vadd.f32 %v2507_v14, %v2999_v40  ;;  %v651_v22 = vpop.f32.mrb[27].mxu0  ;;  %v1132_v14 = vld [vmem:[#allocation2 + $0x12] ss:$2 sm:$0xff]  ;;  %v2782_v18 = vld [vmem:[%s3293_s5 + $0x8] sm:$0xff]  }
 0x119   : > { %v703_v23 = vmax.f32 %v649_v13, 0.0  ;;  %v652_v24 = vadd.f32 %v2999_v40, %v651_v22 }
 0x11a   : > { %779 = vst.msk [vmem:[#allocation2 + $0xfd] sm:$0xff] %vm469_vm0, %v705_v15  ;;  %v706_v25 = vmax.f32 %v660_v20, 0.0  ;;  %v1147_v15 = vpack.c.bf16 %v1134_v12, %v1132_v14  ;;  %v1138_v20 = vld [vmem:[#allocation2 + $0x7e] ss:$2 sm:$0xff] }
 0x11b   : > { %777 = vst.msk [vmem:[#allocation2 + $0xeb] sm:$0xff] %vm469_vm0, %v703_v23  ;;  %v3103_v26 = vld [vmem:[#allocation2 + $0xd8] ss:$2 sm:$0xff]  ;;  %v704_v27 = vmax.f32 %v652_v24, 0.0  ;;  %v3105_v28 = vld [vmem:[#allocation2 + $0xd9] ss:$2 sm:$0xff] }
 0x11c   : > { %v1498_v29 = vpack.c.bf16 %v3103_v26, %v3087_v7  ;;  %780 = vst.msk [vmem:[#allocation2 + $0x105] sm:$0xff] %vm469_vm0, %v706_v25  ;;  %v3112_v31 = vld [vmem:[#allocation2 + $0xda] ss:$2 sm:$0xff]  ;;  %v1605_v32 = vpack.c.bf16 %v3105_v28, %v3085_v6 }
 0x11d   : > { %778 = vst.msk [vmem:[#allocation2 + $0xf3] sm:$0xff] %vm469_vm0, %v704_v27  ;;  %v2510_v34 = vpop.f32.mrb[28].mxu0  ;;  %v1712_v35 = vpack.c.bf16 %v3112_v31, %v3110_v30  ;;  %v1142_v22 = vld [vmem:[#allocation2 + $0xc6] ss:$2 sm:$0xff] }
 0x11e   : > { %v673_v36 = vadd.f32 %v2510_v34, %v2999_v40  ;;  %v664_v41 = vpop.f32.mrb[29].mxu0  ;;  %v1136_v23 = vld [vmem:[#allocation2 + $0x5a] ss:$2 sm:$0xff] }
 0x11f   : > { %v665_v42 = vadd.f32 %v2999_v40, %v664_v41  ;;  %v2511_v43 = vpop.f32.mrb[30].mxu0  ;;  %v1148_v24 = vpack.c.bf16 %v1138_v20, %v1136_v23  ;;  %v1140_v25 = vld [vmem:[#allocation2 + $0xa2] ss:$2 sm:$0xff] }
 0x120   : > { %v709_v44 = vmax.f32 %v673_v36, 0.0  ;;  %v676_v45 = vadd.f32 %v2511_v43, %v2999_v40  ;;  %v667_v46 = vpop.f32.mrb[31].mxu0  ;;  %v2772_v27 = vld [vmem:[%s3291_s3 + $0x48] sm:$0xff]   ;;  %v1149_v34 = vpack.c.bf16 %v1142_v22, %v1140_v25  ;;  %v2773_v36 = vld [vmem:[%s3291_s3 + $0x50] sm:$0xff]   ;;  %v1496_v25 = vpack.c.bf16 %v3150_v4, %v3124_v57  ;;  %v2779_v57 = vld [vmem:[%s3291_s3 + $0x80] sm:$0xff]  }
 0x121   : > { %v707_v47 = vmax.f32 %v665_v42, 0.0  ;;  %v668_v48 = vadd.f32 %v2999_v40, %v667_v46  ;;  %v1255_v42 = vld [vmem:[#allocation2 + $0x37] ss:$2 sm:$0xff]  ;;  %v2776_v14 = vld [vmem:[%s3291_s3 + $0x68] sm:$0xff]  }
 0x122   : > { %783 = vst.msk [vmem:[#allocation2 + $0x121] sm:$0xff] %vm469_vm0, %v709_v44  ;;  %v710_v51 = vmax.f32 %v676_v45, 0.0  ;;  %v1253_v45 = vld [vmem:[#allocation2 + $0x13] ss:$2 sm:$0xff] }
 0x123   : > { %781 = vst.msk [vmem:[#allocation2 + $0x10f] sm:$0xff] %vm469_vm0, %v707_v47  ;;  %v708_v59 = vmax.f32 %v668_v48, 0.0  ;;  %v3127_v60 = vld [vmem:[#allocation2 + $0xfd] ss:$2 sm:$0xff]  ;;  %v3129_v61 = vld [vmem:[#allocation2 + $0xfc] ss:$2 sm:$0xff]  ;;  %v1268_v46 = vpack.c.bf16 %v1255_v42, %v1253_v45 }
 0x124   : > { %784 = vst.msk [vmem:[#allocation2 + $0x129] sm:$0xff] %vm469_vm0, %v710_v51  ;;  %v827_v62 = vpack.c.bf16 %v3127_v60, %v3105_v28  ;;  %v803_v40 = vpack.c.bf16 %v3129_v61, %v3103_v26  ;;  %v3167_v11 = vld [vmem:[#allocation2 + $0xfe] ss:$2 sm:$0xff]  ;;  %v1259_v47 = vld [vmem:[#allocation2 + $0x7f] ss:$2 sm:$0xff]  ;;  %v2777_v20 = vld [vmem:[%s3291_s3 + $0x70] sm:$0xff]  }
 0x125   : > { %782 = vst.msk [vmem:[#allocation2 + $0x117] sm:$0xff] %vm469_vm0, %v708_v59  ;;  %v1029_v13 = vpack.c.bf16 %v3167_v11, %v3112_v31  ;;  %v1144_v43 = vld [vmem:[#allocation2 + $0xea] ss:$2 sm:$0xff]  ;;  %v1263_v48 = vld [vmem:[#allocation2 + $0xc7] ss:$2 sm:$0xff]  ;;  %v1269_v51 = vpack.c.bf16 %v1259_v47, %v1257_v49 }
 0x126   : > { %2521 = vmatmul.mubr.msk.bf16.gmra.mrb[36].mxu0 %vm469_vm0, %v827_v62  ;;  %2533 = vmatmul.mubr.msk.bf16.vlgmr.msra.gmra.mrb[0].mxu1 %vm469_vm0, %v803_v40  ;;  %v2774_v59 = vld [vmem:[%s3291_s3 + $0x58] sm:$0xff]   ;;  %v1270_v62 = vpack.c.bf16 %v1263_v48, %v1261_v38  ;;  %v2775_v40 = vld [vmem:[%s3291_s3 + $0x60] sm:$0xff]  }
 0x127   : > { %2537 = vmatpush3.bf16.msra.mxu1 %v2993_v39  ;;  %2528 = vmatprep.mubr.msk.bf16.mxu0 %vm469_vm0, %v800_v0  ;;  %v2770_v39 = vld [vmem:[%s3291_s3 + $0x38] sm:$0xff]   ;;  %v2334_v26 = vld [vmem:[%s3292_s4] ss:$0 sm:$0xff] }
 0x128   : > { %2540 = vmatprep.mubr.msk.bf16.mxu1 %vm469_vm0, %v1026_v1  ;;  %2538 = vmatprep.subr.bf16.mxu1 %v2768_v63  ;;  %v1376_v0 = vld [vmem:[#allocation2 + $0x38] ss:$2 sm:$0xff]  ;;  %v1265_v1 = vld [vmem:[#allocation2 + $0xeb] ss:$2 sm:$0xff] }
 0x129   : > { %v1386_v23 = vld [vmem:[#allocation2 + $0xec] ss:$2 sm:$0xff] }
 0x12b   : > { %2539 = vmatpush3.bf16.msra.mxu1 %v2768_v63  ;;  %v1495_v4 = vld [vmem:[#allocation2 + $0x120] ss:$2 sm:$0xff]  ;;  %v1602_v37 = vld [vmem:[#allocation2 + $0x121] ss:$2 sm:$0xff] }
 0x12c   : > { %2548 = vmatprep.subr.bf16.mxu1 %v2769_v3  ;;  %v1146_v41 = vld [vmem:[#allocation2 + $0x10e] ss:$2 sm:$0xff]  ;;  %v1267_v63 = vld [vmem:[#allocation2 + $0x10f] ss:$2 sm:$0xff]  ;;  %v1606_v2 = vpack.c.bf16 %v1602_v37, %v3127_v60 }
 0x12d   : > { %v1150_v44 = vpack.c.bf16 %v1146_v41, %v1144_v43  ;;  %v1388_v22 = vld [vmem:[#allocation2 + $0x110] ss:$2 sm:$0xff] }
 0x12e   : > { %2529 = vmatmul.mubr.msk.bf16.vlgmr.msra.gmra.mrb[32].mxu0 %vm469_vm0, %v801_v5  ;;  %2541 = vmatmul.mubr.msk.bf16.vlgmr.msra.gmra.mrb[4].mxu1 %vm469_vm0, %v1027_v8  ;;  %v1374_v5 = vld [vmem:[#allocation2 + $0x14] ss:$2 sm:$0xff] }
 0x12f   : > { %2549 = vmatpush3.bf16.msra.mxu1 %v2769_v3  ;;  %2544 = vmatprep.mubr.msk.bf16.mxu1 %vm469_vm0, %v1028_v9  ;;  %v1271_v3 = vpack.c.bf16 %v1267_v63, %v1265_v1  ;;  %v1389_v8 = vpack.c.bf16 %v1376_v0, %v1374_v5  ;;  %v1384_v9 = vld [vmem:[#allocation2 + $0xc8] ss:$2 sm:$0xff] }
 0x130   : > { %2550 = vmatprep.subr.bf16.mxu1 %v2770_v39  ;;  %v1709_v16 = vld [vmem:[#allocation2 + $0x122] ss:$2 sm:$0xff]  ;;  %2621 = vmatpush3.bf16.msra.mxu0 %v2781_v17 }
 0x131   : > { %2622 = vmatprep.subr.bf16.mxu0 %v2782_v18  ;;  %v2784_v0 = vld [vmem:[%s3295_s7 + $0x8] sm:$0xff]  }
 0x133   : > { %2551 = vmatpush3.bf16.msra.mxu1 %v2770_v39  ;;  %v1380_v39 = vld [vmem:[#allocation2 + $0x80] ss:$2 sm:$0xff] }
 0x134   : > { %2560 = vmatprep.subr.bf16.mxu1 %v2771_v10  ;;  %2623 = vmatpush3.bf16.msra.mxu0 %v2782_v18 }
 0x136   : > { %2545 = vmatmul.mubr.msk.bf16.gmra.mrb[0].mxu1 %vm469_vm0, %v1029_v13  ;;  %v1382_v13 = vld [vmem:[#allocation2 + $0xa4] ss:$2 sm:$0xff] }
 0x137   : > { %2552 = vmatprep.mubr.msk.bf16.mxu1 %vm469_vm0, %v1147_v15  ;;  %v1391_v15 = vpack.c.bf16 %v1384_v9, %v1382_v13 }
 0x13e   : > { %2553 = vmatmul.mubr.msk.bf16.vlgmr.msra.gmra.mrb[4].mxu1 %vm469_vm0, %v1148_v24  ;;  %v1392_v24 = vpack.c.bf16 %v1388_v22, %v1386_v23  ;;  %v2010_v23 = vld [vmem:[#allocation3 + $0x40] ss:$2 sm:$0xff] }
 0x13f   : > { %2561 = vmatpush3.bf16.msra.mxu1 %v2771_v10  ;;  %2556 = vmatprep.mubr.msk.bf16.mxu1 %vm469_vm0, %v1149_v34  ;;  %v1378_v10 = vld [vmem:[#allocation2 + $0x5c] ss:$2 sm:$0xff]  ;;  %v1499_v34 = vpack.c.bf16 %v1495_v4, %v3129_v61 }
 0x140   : > { %2562 = vmatprep.subr.bf16.mxu1 %v2772_v27  ;;  %v1390_v12 = vpack.c.bf16 %v1380_v39, %v1378_v10  ;;  %v2006_v10 = vld [vmem:[#allocation3] ss:$2 sm:$0xff] }
 0x143   : > { %2563 = vmatpush3.bf16.msra.mxu1 %v2772_v27  ;;  %v2778_v27 = vld [vmem:[%s3291_s3 + $0x78] sm:$0xff]  }
 0x144   : > { %2572 = vmatprep.subr.bf16.mxu1 %v2773_v36 }
 0x146   : > { %2557 = vmatmul.mubr.msk.bf16.gmra.mrb[0].mxu1 %vm469_vm0, %v1150_v44 }
 0x147   : > { %2564 = vmatprep.mubr.msk.bf16.mxu1 %vm469_vm0, %v1268_v46 }
 0x14e   : > { %2565 = vmatmul.mubr.msk.bf16.vlgmr.msra.gmra.mrb[4].mxu1 %vm469_vm0, %v1269_v51 }
 0x14f   : > { %2573 = vmatpush3.bf16.msra.mxu1 %v2773_v36  ;;  %2568 = vmatprep.mubr.msk.bf16.mxu1 %vm469_vm0, %v1270_v62 }
 0x150   : > { %2574 = vmatprep.subr.bf16.mxu1 %v2774_v59 }
 0x153   : > { %2575 = vmatpush3.bf16.msra.mxu1 %v2774_v59 }
 0x154   : > { %2584 = vmatprep.subr.bf16.mxu1 %v2775_v40 }
 0x156   : > { %2569 = vmatmul.mubr.msk.bf16.gmra.mrb[0].mxu1 %vm469_vm0, %v1271_v3 }
 0x157   : > { %2576 = vmatprep.mubr.msk.bf16.mxu1 %vm469_vm0, %v1389_v8 }
 0x15e   : > { %2577 = vmatmul.mubr.msk.bf16.vlgmr.msra.gmra.mrb[4].mxu1 %vm469_vm0, %v1390_v12  ;;  %v2008_v12 = vld [vmem:[#allocation3 + $0x20] ss:$2 sm:$0xff] }
 0x15f   : > { %2585 = vmatpush3.bf16.msra.mxu1 %v2775_v40  ;;  %2580 = vmatprep.mubr.msk.bf16.mxu1 %vm469_vm0, %v1391_v15  ;;  %v2021_v22 = vpack.c.bf16 %v2008_v12, %v2006_v10 }
 0x160   : > { %2586 = vmatprep.subr.bf16.mxu1 %v2776_v14 }
 0x163   : > { %2587 = vmatpush3.bf16.msra.mxu1 %v2776_v14 }
 0x164   : > { %2596 = vmatprep.subr.bf16.mxu1 %v2777_v20 }
 0x166   : > { %2581 = vmatmul.mubr.msk.bf16.gmra.mrb[0].mxu1 %vm469_vm0, %v1392_v24  ;;  %v2012_v24 = vld [vmem:[#allocation3 + $0x60] ss:$2 sm:$0xff] }
 0x167   : > { %2588 = vmatprep.mubr.msk.bf16.mxu1 %vm469_vm0, %v1496_v25  ;;  %v2014_v25 = vld [vmem:[#allocation3 + $0x80] ss:$2 sm:$0xff] }
 0x16e   : > { %2589 = vmatmul.mubr.msk.bf16.vlgmr.msra.gmra.mrb[4].mxu1 %vm469_vm0, %v1497_v54 }
 0x16f   : > { %2597 = vmatpush3.bf16.msra.mxu1 %v2777_v20  ;;  %2592 = vmatprep.mubr.msk.bf16.mxu1 %vm469_vm0, %v1498_v29 }
 0x170   : > { %2598 = vmatprep.subr.bf16.mxu1 %v2778_v27 }
 0x173   : > { %2599 = vmatpush3.bf16.msra.mxu1 %v2778_v27  ;;  %v2016_v27 = vld [vmem:[#allocation3 + $0xa0] ss:$2 sm:$0xff] }
 0x174   : > { %2608 = vmatprep.subr.bf16.mxu1 %v2779_v57  ;;  %v2023_v4 = vpack.c.bf16 %v2016_v27, %v2014_v25 }
 0x176   : > { %2593 = vmatmul.mubr.msk.bf16.gmra.mrb[0].mxu1 %vm469_vm0, %v1499_v34  ;;  %v2018_v34 = vld [vmem:[#allocation3 + $0xc0] ss:$2 sm:$0xff] }
 0x177   : > { %2600 = vmatprep.mubr.msk.bf16.mxu1 %vm469_vm0, %v1603_v19  ;;  %v1713_v19 = vpack.c.bf16 %v1709_v16, %v3167_v11  ;;  %v2342_v16 = vld [vmem:[%s3296_s8] ss:$0 sm:$0xff] }
 0x17e   : > { %2601 = vmatmul.mubr.msk.bf16.vlgmr.msra.gmra.mrb[4].mxu1 %vm469_vm0, %v1604_v53 }
 0x17f   : > { %2609 = vmatpush3.bf16.msra.mxu1 %v2779_v57  ;;  %2604 = vmatprep.mubr.msk.bf16.mxu1 %vm469_vm0, %v1605_v32  ;;  %v2022_v57 = vpack.c.bf16 %v2012_v24, %v2010_v23 }
 0x180   : > { %2610 = vmatprep.subr.bf16.mxu1 %v2780_v50 }
 0x183   : > { %2611 = vmatpush3.bf16.msra.mxu1 %v2780_v50  ;;  %v2020_v50 = vld [vmem:[#allocation3 + $0xe0] ss:$2 sm:$0xff] }
 0x184   : > { %v2024_v37 = vpack.c.bf16 %v2020_v50, %v2018_v34 }
 0x186   : > { %2605 = vmatmul.mubr.msk.bf16.gmra.mrb[0].mxu1 %vm469_vm0, %v1606_v2  ;;  %v2335_v2 = vld [vmem:[%s3294_s6] ss:$0 sm:$0xff] }
 0x187   : > { %2612 = vmatprep.mubr.msk.bf16.mxu1 %vm469_vm0, %v1710_v21  ;;  %v2783_v21 = vld [vmem:[%s3295_s7] sm:$0xff]  }
 0x188   : > { %2632 = vmatprep.subr.bf16.mxu0 %v2783_v21 }
 0x18e   : > { %2613 = vmatmul.mubr.msk.bf16.vlgmr.msra.gmra.mrb[4].mxu1 %vm469_vm0, %v1711_v58 }
 0x18f   : > { %2616 = vmatprep.mubr.msk.bf16.mxu1 %vm469_vm0, %v1712_v35 }
 0x196   : > { %2617 = vmatmul.mubr.msk.bf16.gmra.mrb[0].mxu1 %vm469_vm0, %v1713_v19  ;;  %v2662_v19 = vadd.f32 %v2342_v16, %v2335_v2 }
 0x1f9   : > { %v2522_v33 = vpop.f32.mrb[36].mxu0 }
 0x1fa   : > { %v906_v52 = vpop.f32.mrb[37].mxu0 }
 0x1fb   : > { %v2523_v53 = vpop.f32.mrb[38].mxu0 }
 0x1fc   : > { %v909_v54 = vpop.f32.mrb[39].mxu0 }
 0x201   : > { %v2530_v55 = vpop.f32.mrb[32].mxu0 }
 0x202   : > { %v979_v56 = vpop.f32.mrb[33].mxu0 }
 0x203   : > { %v2531_v58 = vpop.f32.mrb[34].mxu0 }
 0x204   : > { %v982_v6 = vpop.f32.mrb[35].mxu0 }
 0x261   : > { %v2614_v7 = vpop.f32.mrb[4].mxu1 }
 0x262   : > { %v2648_v28 = vadd.f32 %v2614_v7, %v2530_v55  ;;  %v1776_v29 = vpop.f32.mrb[5].mxu1 }
 0x263   : > { %v2649_v30 = vadd.f32 %v1776_v29, %v979_v56  ;;  %v2615_v31 = vpop.f32.mrb[6].mxu1 }
 0x264   : > { %v1824_v32 = vadd.f32 %v2648_v28, %v2334_v26  ;;  %v2650_v35 = vadd.f32 %v2615_v31, %v2531_v58  ;;  %v1779_v60 = vpop.f32.mrb[7].mxu1 }
 0x265   : > { %v1822_v61 = vadd.f32 %v2649_v30, %v2334_v26  ;;  %v2651_v11 = vadd.f32 %v1779_v60, %v982_v6 }
 0x266   : > { %v1825_v36 = vadd.f32 %v2650_v35, %v2334_v26  ;;  %v1832_v42 = vmax.f32 %v1824_v32, 0.0 }
 0x267   : > { %v1823_v41 = vadd.f32 %v2651_v11, %v2334_v26  ;;  %v1830_v44 = vmax.f32 %v1822_v61, 0.0 }
 0x268   : > { %v1833_v43 = vmax.f32 %v1825_v36, 0.0 }
 0x269   : > { %v1831_v45 = vmax.f32 %v1823_v41, 0.0  ;;  %v2618_v46 = vpop.f32.mrb[0].mxu1 }
 0x26a   : > { %v1839_v47 = vpack.c.bf16 %v1833_v43, %v1832_v42  ;;  %v2652_v48 = vadd.f32 %v2618_v46, %v2522_v33  ;;  %v1792_v49 = vpop.f32.mrb[1].mxu1 }
 0x26b   : > { %v1838_v51 = vpack.c.bf16 %v1831_v45, %v1830_v44  ;;  %v2653_v38 = vadd.f32 %v1792_v49, %v906_v52  ;;  %v2619_v59 = vpop.f32.mrb[2].mxu1 }
 0x26c   : > { %v1828_v62 = vadd.f32 %v2652_v48, %v2334_v26  ;;  %v2654_v40 = vadd.f32 %v2619_v59, %v2523_v53  ;;  %v1795_v63 = vpop.f32.mrb[3].mxu1 }
 0x26d   : > { %v1826_v1 = vadd.f32 %v2653_v38, %v2334_v26  ;;  %v2655_v3 = vadd.f32 %v1795_v63, %v909_v54  ;;  %2624 = vmatprep.mubr.msk.bf16.mxu0 %vm469_vm0, %v1838_v51 }
 0x26e   : > { %v1829_v5 = vadd.f32 %v2654_v40, %v2334_v26  ;;  %2625 = vmatmul.mubr.msk.bf16.vlgmr.msra.gmra.mrb[40].mxu0 %vm469_vm0, %v1839_v47  ;;  %v1836_v39 = vmax.f32 %v1828_v62, 0.0 }
 0x26f   : > { %v1827_v8 = vadd.f32 %v2655_v3, %v2334_v26  ;;  %2633 = vmatpush3.bf16.msra.mxu0 %v2783_v21  ;;  %v1834_v13 = vmax.f32 %v1826_v1, 0.0 }
 0x270   : > { %v1837_v9 = vmax.f32 %v1829_v5, 0.0  ;;  %2634 = vmatprep.subr.bf16.mxu0 %v2784_v0 }
 0x271   : > { %v1835_v14 = vmax.f32 %v1827_v8, 0.0 }
 0x272   : > { %v1841_v15 = vpack.c.bf16 %v1837_v9, %v1836_v39 }
 0x273   : > { %v1840_v20 = vpack.c.bf16 %v1835_v14, %v1834_v13  ;;  %2635 = vmatpush3.bf16.msra.mxu0 %v2784_v0 }
 0x275   : > { %2628 = vmatprep.mubr.msk.bf16.mxu0 %vm469_vm0, %v1840_v20 }
 0x276   : > { %2629 = vmatmul.mubr.msk.bf16.gmra.mrb[44].mxu0 %vm469_vm0, %v1841_v15 }
 0x277   : > { %2636 = vmatprep.mubr.msk.bf16.mxu0 %vm469_vm0, %v2021_v22 }
 0x27e   : > { %2637 = vmatmul.mubr.msk.bf16.vlgmr.msra.gmra.mrb[40].mxu0 %vm469_vm0, %v2022_v57 }
 0x27f   : > { %2640 = vmatprep.mubr.msk.bf16.mxu0 %vm469_vm0, %v2023_v4 }
 0x286   : > { %2641 = vmatmul.mubr.msk.bf16.gmra.mrb[44].mxu0 %vm469_vm0, %v2024_v37 }
 0x351   : > { %v2638_v17 = vpop.f32.mrb[40].mxu0 }
 0x352   : > { %v2656_v18 = vadd.f32 %v2638_v17, %v2335_v2  ;;  %v2094_v21 = vpop.f32.mrb[41].mxu0 }
 0x353   : > { %v2658_v33 = vadd.f32 %v2335_v2, %v2094_v21  ;;  %v2639_v52 = vpop.f32.mrb[42].mxu0 }
 0x354   : > { %v2657_v53 = vadd.f32 %v2656_v18, %v2342_v16  ;;  %v2661_v54 = vadd.f32 %v2662_v19, %v2639_v52  ;;  %v2097_v55 = vpop.f32.mrb[43].mxu0 }
 0x355   : > { %v2659_v56 = vadd.f32 %v2658_v33, %v2342_v16  ;;  %v2663_v58 = vadd.f32 %v2662_v19, %v2097_v55 }
 0x356   : > { %v2135_v6 = vmax.f32 %v2657_v53, 0.0  ;;  %v2136_v7 = vmax.f32 %v2661_v54, 0.0 }
 0x357   : > { %v2133_v26 = vmax.f32 %v2659_v56, 0.0  ;;  %v2134_v28 = vmax.f32 %v2663_v58, 0.0 }
 0x358   : > { %v2377_v29 = vpack.c.bf16 %v2136_v7, %v2135_v6 }
 0x359   : > { %v2372_v30 = vpack.c.bf16 %v2134_v28, %v2133_v26  ;;  %v2642_v31 = vpop.f32.mrb[44].mxu0 }
 0x35a   : > { %2389 = vst [vmem:[%s332_s17 + $0x8] sm:$0xff] %v2377_v29   ;;  %v2665_v32 = vadd.f32 %v2662_v19, %v2642_v31  ;;  %v2110_v35 = vpop.f32.mrb[45].mxu0 }
 0x35b   : > { %2373 = vst [vmem:[%s332_s17] sm:$0xff] %v2372_v30   ;;  %v2667_v60 = vadd.f32 %v2662_v19, %v2110_v35  ;;  %v2643_v61 = vpop.f32.mrb[46].mxu0 }
 0x35c   : > { %v2669_v11 = vadd.f32 %v2662_v19, %v2643_v61  ;;  %v2113_v36 = vpop.f32.mrb[47].mxu0  ;;  %v2139_v42 = vmax.f32 %v2665_v32, 0.0 }
 0x35d   : > { %v2671_v41 = vadd.f32 %v2662_v19, %v2113_v36  ;;  %v2137_v44 = vmax.f32 %v2667_v60, 0.0 }
 0x35e   : > { %v2140_v43 = vmax.f32 %v2669_v11, 0.0 }
 0x35f   : > { %v2138_v45 = vmax.f32 %v2671_v41, 0.0 }
 0x360   : > { %v2387_v46 = vpack.c.bf16 %v2140_v43, %v2139_v42 }
 0x361   : > { %v2382_v47 = vpack.c.bf16 %v2138_v45, %v2137_v44 }
 0x362   : > { %2391 = vst [vmem:[%s332_s17 + $0x18] sm:$0xff] %v2387_v46  }
 0x363   : > { %2390 = vst [vmem:[%s332_s17 + $0x10] sm:$0xff] %v2382_v47  }
 0x364 PF: > { %s19_s30 = sadd.s32 1, %s2807_s30  }
 0x365   : > { %p16_p4 = scmp.ge.s32.totalorder %s19_s30, 4  }
 0x367   :  { %18 = sbr.rel (!%p16_p4) target bundleno = 1 (0x1), region = 143 }

</bundles_post_ra>
